<compile_context>
chip_gen: v5e
topology: v5e:2x2
jax: 0.10.0
libtpu: 0.0.40
codegen_flags: <defaults>
</compile_context>

<pallas_src>
import jax
import jax.numpy as jnp
from jax.experimental import pallas as pl
from jax.experimental.pallas import tpu as pltpu


def _round_up(x, m):
    return ((x + m - 1) // m) * m


def _mlp_kernel(x_ref, w1_ref, b1_ref, alpha_ref, w2_ref, b2_ref, out_ref):
    x = x_ref[...]                                            # [T, 784] bf16

    # ---- Linear(784 -> 392), bf16 MXU, f32 accumulate -----------------
    h = jnp.dot(x, w1_ref[...], preferred_element_type=jnp.float32)
    h = h + b1_ref[...]                                       # [T, 392] f32

    # ---- MIX activation ------------------------------------------------
    # TODO(synk): `mixed_activations.MIX` source not provided; implemented as
    # a per-neuron softmax-normalized convex combination of {relu, sigmoid,
    # tanh, identity}. alpha_ref already holds the normalized weights
    # (softmax hoisted to the wrapper since it is grid-invariant).
    alpha = alpha_ref[...]                                    # [4, 392] f32
    a0 = alpha[0][None, :]
    a1 = alpha[1][None, :]
    a2 = alpha[2][None, :]
    a3 = alpha[3][None, :]

    # sigmoid via tanh: sigmoid(h) = 0.5 * (tanh(0.5*h) + 1)  (no divide,
    # one fewer EUP-class op than exp+recip)
    h_mix = a0 * jnp.maximum(h, 0.0)
    h_mix = h_mix + a1 * (0.5 * (jnp.tanh(0.5 * h) + 1.0))
    h_mix = h_mix + a2 * jnp.tanh(h)
    h_mix = h_mix + a3 * h                                    # [T, 392] f32

    # ---- Linear(392 -> 10), bf16 MXU, f32 accumulate -------------------
    logits = jnp.dot(h_mix.astype(jnp.bfloat16), w2_ref[...],
                     preferred_element_type=jnp.float32)
    logits = logits + b2_ref[...]                             # [T, 10] f32

    # ---- LogSoftmax(dim=1) in f32 --------------------------------------
    m = jnp.max(logits, axis=1, keepdims=True)
    lse = m + jnp.log(jnp.sum(jnp.exp(logits - m), axis=1, keepdims=True))
    out_ref[...] = logits - lse


def network_forward(x, w1, b1, alpha, w2, b2, *, tile_n=512):
    """Pallas equivalent of Network.forward. Returns (log_probs, None, None, None)."""
    n, in_dim = x.shape
    hid = w1.shape[1]
    n_classes = w2.shape[1]

    # Tile the batch: multiple of 8 (sublane), capped at 512 (safe on v5e's
    # 16 MiB default scoped VMEM and v7x's 64 MiB physical VMEM).
    tile_n = min(tile_n, _round_up(n, 8))
    n_pad = _round_up(n, tile_n)

    # bf16 operands for the MXU; halves HBM traffic for x / w1 / w2.
    x_bf = x.astype(jnp.bfloat16)
    if n_pad != n:
        x_bf = jnp.pad(x_bf, ((0, n_pad - n), (0, 0)))
    w1_bf = w1.astype(jnp.bfloat16)
    w2_bf = w2.astype(jnp.bfloat16)

    # Grid-invariant softmax over the 4 mixing logits, computed once here.
    a32 = alpha.astype(jnp.float32)
    a32 = a32 - jnp.max(a32, axis=0, keepdims=True)
    a_exp = jnp.exp(a32)
    alpha_n = a_exp / jnp.sum(a_exp, axis=0, keepdims=True)   # [4, hid]

    b1_f = b1.astype(jnp.float32)
    b2_f = b2.astype(jnp.float32)

    grid = (n_pad // tile_n,)

    out = pl.pallas_call(
        _mlp_kernel,
        out_shape=jax.ShapeDtypeStruct((n_pad, n_classes), jnp.float32),
        grid=grid,
        in_specs=[
            # batch-tiled input: double-buffered DMA pipeline over the grid
            pl.BlockSpec((tile_n, in_dim), lambda i: (i, 0)),
            # weights / bias / alpha: constant index_map -> VMEM-resident
            pl.BlockSpec((in_dim, hid), lambda i: (0, 0)),
            pl.BlockSpec((1, hid), lambda i: (0, 0)),
            pl.BlockSpec((4, hid), lambda i: (0, 0)),
            pl.BlockSpec((hid, n_classes), lambda i: (0, 0)),
            pl.BlockSpec((1, n_classes), lambda i: (0, 0)),
        ],
        # NOTE: 10-wide output -> masked stores, but output volume is tiny;
        # lane-dense padding not worth it here.
        out_specs=pl.BlockSpec((tile_n, n_classes), lambda i: (i, 0)),
        compiler_params=pltpu.CompilerParams(
            dimension_semantics=("parallel",)),
    )(x_bf, w1_bf, b1_f, alpha_n, w2_bf, b2_f)

    return (out[:n], None, None, None)


def init_params(key):
    """Deterministic init mimicking nn.Linear default (U[-1/sqrt(fan_in), +])."""
    in0, hid, n_classes = 784, 392, 10
    k1, k2, k3, k4, k5 = jax.random.split(key, 5)

    lim1 = 1.0 / jnp.sqrt(in0)
    w1 = jax.random.uniform(k1, (in0, hid), jnp.float32, -lim1, lim1)
    b1 = jax.random.uniform(k2, (1, hid), jnp.float32, -lim1, lim1)

    # MIX mixing logits, one per (activation, neuron)
    alpha = jax.random.normal(k3, (4, hid), jnp.float32) * 0.1

    lim2 = 1.0 / jnp.sqrt(hid)
    w2 = jax.random.uniform(k4, (hid, n_classes), jnp.float32, -lim2, lim2)
    b2 = jax.random.uniform(k5, (1, n_classes), jnp.float32, -lim2, lim2)
    return w1, b1, alpha, w2, b2


if __name__ == "__main__":
    key = jax.random.PRNGKey(0)
    k_in, k_par = jax.random.split(key)

    batch = 8
    x = jax.random.normal(k_in, (batch, 784), jnp.float32)
    w1, b1, alpha, w2, b2 = init_params(k_par)

    out, _, _, _ = network_forward(x, w1, b1, alpha, w2, b2)
    out = jax.block_until_ready(out)

    # sanity: log-softmax rows must exp-sum to ~1
    row_sums = jnp.exp(out).sum(axis=1)
    assert out.shape == (batch, 10)
    assert bool(jnp.all(jnp.abs(row_sums - 1.0) < 1e-4))

    print("KERNEL_OK")
</pallas_src>

<mosaic_0001>
module attributes {stable_mosaic.version = 11 : i64} {
  func.func @_mlp_kernel(%arg0: i32, %arg1: memref<8x784xbf16, #tpu.memory_space<vmem>>, %arg2: memref<784x392xbf16, #tpu.memory_space<vmem>>, %arg3: memref<1x392xf32, #tpu.memory_space<vmem>>, %arg4: memref<4x392xf32, #tpu.memory_space<vmem>>, %arg5: memref<392x10xbf16, #tpu.memory_space<vmem>>, %arg6: memref<1x10xf32, #tpu.memory_space<vmem>>, %arg7: memref<8x10xf32, #tpu.memory_space<vmem>>) attributes {dimension_semantics = [#tpu.dimension_semantics<parallel>], iteration_bounds = array<i64: 1>, scalar_prefetch = 0 : i64, scratch_operands = 0 : i64, tpu.core_type = #tpu.core_type<tc>, window_params = [{transform_indices = @transform_0, window_bounds = array<i64: 8, 784>}, {pipeline_mode = #tpu.pipeline_mode<synchronous>, transform_indices = @transform_1, window_bounds = array<i64: 784, 392>}, {pipeline_mode = #tpu.pipeline_mode<synchronous>, transform_indices = @transform_2, window_bounds = array<i64: 1, 392>}, {pipeline_mode = #tpu.pipeline_mode<synchronous>, transform_indices = @transform_3, window_bounds = array<i64: 4, 392>}, {pipeline_mode = #tpu.pipeline_mode<synchronous>, transform_indices = @transform_4, window_bounds = array<i64: 392, 10>}, {pipeline_mode = #tpu.pipeline_mode<synchronous>, transform_indices = @transform_5, window_bounds = array<i64: 1, 10>}, {transform_indices = @transform_6, window_bounds = array<i64: 8, 10>}]} {
    %c0 = arith.constant 0 : index
    %c0_0 = arith.constant 0 : index
    %0 = vector.load %arg1[%c0, %c0_0] : memref<8x784xbf16, #tpu.memory_space<vmem>>, vector<8x784xbf16>
    %c0_1 = arith.constant 0 : index
    %c0_2 = arith.constant 0 : index
    %1 = vector.load %arg2[%c0_1, %c0_2] : memref<784x392xbf16, #tpu.memory_space<vmem>>, vector<784x392xbf16>
    %cst = arith.constant dense<0.000000e+00> : vector<8x392xf32>
    %2 = tpu.matmul %0, %1, %cst {dimension_numbers = #tpu.dot_dimension_numbers<[1], [0], [0], [1], [0, 0, 1, 1], [], []>} : vector<8x784xbf16>, vector<784x392xbf16>, vector<8x392xf32> -> vector<8x392xf32>
    %c0_3 = arith.constant 0 : index
    %c0_4 = arith.constant 0 : index
    %3 = vector.load %arg3[%c0_3, %c0_4] : memref<1x392xf32, #tpu.memory_space<vmem>>, vector<1x392xf32>
    %4 = vector.broadcast %3 : vector<1x392xf32> to vector<8x392xf32>
    %5 = arith.addf %2, %4 : vector<8x392xf32>
    %c0_5 = arith.constant 0 : index
    %c0_6 = arith.constant 0 : index
    %6 = vector.load %arg4[%c0_5, %c0_6] : memref<4x392xf32, #tpu.memory_space<vmem>>, vector<4x392xf32>
    %7 = vector.extract_strided_slice %6 {offsets = [0, 0], sizes = [1, 392], strides = [1, 1]} : vector<4x392xf32> to vector<1x392xf32>
    %8 = vector.shape_cast %7 : vector<1x392xf32> to vector<392xf32>
    %9 = vector.shape_cast %8 : vector<392xf32> to vector<1x392xf32>
    %10 = vector.extract_strided_slice %6 {offsets = [1, 0], sizes = [1, 392], strides = [1, 1]} : vector<4x392xf32> to vector<1x392xf32>
    %11 = vector.shape_cast %10 : vector<1x392xf32> to vector<392xf32>
    %12 = vector.shape_cast %11 : vector<392xf32> to vector<1x392xf32>
    %13 = vector.extract_strided_slice %6 {offsets = [2, 0], sizes = [1, 392], strides = [1, 1]} : vector<4x392xf32> to vector<1x392xf32>
    %14 = vector.shape_cast %13 : vector<1x392xf32> to vector<392xf32>
    %15 = vector.shape_cast %14 : vector<392xf32> to vector<1x392xf32>
    %16 = vector.extract_strided_slice %6 {offsets = [3, 0], sizes = [1, 392], strides = [1, 1]} : vector<4x392xf32> to vector<1x392xf32>
    %17 = vector.shape_cast %16 : vector<1x392xf32> to vector<392xf32>
    %18 = vector.shape_cast %17 : vector<392xf32> to vector<1x392xf32>
    %cst_7 = arith.constant 0.000000e+00 : f32
    %19 = vector.broadcast %cst_7 : f32 to vector<8x392xf32>
    %20 = arith.maximumf %5, %19 : vector<8x392xf32>
    %21 = vector.broadcast %9 : vector<1x392xf32> to vector<8x392xf32>
    %22 = arith.mulf %21, %20 : vector<8x392xf32>
    %cst_8 = arith.constant 5.000000e-01 : f32
    %23 = vector.broadcast %cst_8 : f32 to vector<8x392xf32>
    %24 = arith.mulf %23, %5 : vector<8x392xf32>
    %25 = math.tanh %24 : vector<8x392xf32>
    %cst_9 = arith.constant 1.000000e+00 : f32
    %26 = vector.broadcast %cst_9 : f32 to vector<8x392xf32>
    %27 = arith.addf %25, %26 : vector<8x392xf32>
    %cst_10 = arith.constant 5.000000e-01 : f32
    %28 = vector.broadcast %cst_10 : f32 to vector<8x392xf32>
    %29 = arith.mulf %28, %27 : vector<8x392xf32>
    %30 = vector.broadcast %12 : vector<1x392xf32> to vector<8x392xf32>
    %31 = arith.mulf %30, %29 : vector<8x392xf32>
    %32 = arith.addf %22, %31 : vector<8x392xf32>
    %33 = math.tanh %5 : vector<8x392xf32>
    %34 = vector.broadcast %15 : vector<1x392xf32> to vector<8x392xf32>
    %35 = arith.mulf %34, %33 : vector<8x392xf32>
    %36 = arith.addf %32, %35 : vector<8x392xf32>
    %37 = vector.broadcast %18 : vector<1x392xf32> to vector<8x392xf32>
    %38 = arith.mulf %37, %5 : vector<8x392xf32>
    %39 = arith.addf %36, %38 : vector<8x392xf32>
    %40 = arith.truncf %39 : vector<8x392xf32> to vector<8x392xbf16>
    %c0_11 = arith.constant 0 : index
    %c0_12 = arith.constant 0 : index
    %41 = vector.load %arg5[%c0_11, %c0_12] : memref<392x10xbf16, #tpu.memory_space<vmem>>, vector<392x10xbf16>
    %cst_13 = arith.constant dense<0.000000e+00> : vector<8x10xf32>
    %42 = tpu.matmul %40, %41, %cst_13 {dimension_numbers = #tpu.dot_dimension_numbers<[1], [0], [0], [1], [0, 0, 1, 1], [], []>} : vector<8x392xbf16>, vector<392x10xbf16>, vector<8x10xf32> -> vector<8x10xf32>
    %c0_14 = arith.constant 0 : index
    %c0_15 = arith.constant 0 : index
    %43 = vector.load %arg6[%c0_14, %c0_15] : memref<1x10xf32, #tpu.memory_space<vmem>>, vector<1x10xf32>
    %44 = vector.broadcast %43 : vector<1x10xf32> to vector<8x10xf32>
    %45 = arith.addf %42, %44 : vector<8x10xf32>
    %cst_16 = arith.constant dense<0xFF800000> : vector<8xf32>
    %46 = vector.multi_reduction <maximumf>, %45, %cst_16 [1] : vector<8x10xf32> to vector<8xf32>
    %47 = vector.shape_cast %46 : vector<8xf32> to vector<8x1xf32>
    %48 = vector.broadcast %47 : vector<8x1xf32> to vector<8x10xf32>
    %49 = arith.subf %45, %48 : vector<8x10xf32>
    %50 = math.exp %49 : vector<8x10xf32>
    %cst_17 = arith.constant dense<0.000000e+00> : vector<8xf32>
    %51 = vector.multi_reduction <add>, %50, %cst_17 [1] : vector<8x10xf32> to vector<8xf32>
    %52 = vector.shape_cast %51 : vector<8xf32> to vector<8x1xf32>
    %53 = math.log %52 : vector<8x1xf32>
    %54 = arith.addf %47, %53 : vector<8x1xf32>
    %55 = vector.broadcast %54 : vector<8x1xf32> to vector<8x10xf32>
    %56 = arith.subf %45, %55 : vector<8x10xf32>
    %c0_18 = arith.constant 0 : index
    %c0_19 = arith.constant 0 : index
    %57 = vector.load %arg7[%c0_18, %c0_19] : memref<8x10xf32, #tpu.memory_space<vmem>>, vector<8x10xf32>
    tpu.vector_store %arg7[%c0_18, %c0_19], %56 {strides = array<i32>} : memref<8x10xf32, #tpu.memory_space<vmem>>, vector<8x10xf32>,
    return
  }
  func.func @transform_0(%arg0: i32) -> (i32, i32) {
    %c0_i32 = arith.constant 0 : i32
    %c0_i32_0 = arith.constant 0 : i32
    return %arg0, %c0_i32 : i32, i32
  }
  func.func @transform_1(%arg0: i32) -> (i32, i32) {
    %c0_i32 = arith.constant 0 : i32
    %c0_i32_0 = arith.constant 0 : i32
    %c0_i32_1 = arith.constant 0 : i32
    return %c0_i32, %c0_i32_0 : i32, i32
  }
  func.func @transform_2(%arg0: i32) -> (i32, i32) {
    %c0_i32 = arith.constant 0 : i32
    %c0_i32_0 = arith.constant 0 : i32
    %c0_i32_1 = arith.constant 0 : i32
    return %c0_i32, %c0_i32_0 : i32, i32
  }
  func.func @transform_3(%arg0: i32) -> (i32, i32) {
    %c0_i32 = arith.constant 0 : i32
    %c0_i32_0 = arith.constant 0 : i32
    %c0_i32_1 = arith.constant 0 : i32
    return %c0_i32, %c0_i32_0 : i32, i32
  }
  func.func @transform_4(%arg0: i32) -> (i32, i32) {
    %c0_i32 = arith.constant 0 : i32
    %c0_i32_0 = arith.constant 0 : i32
    %c0_i32_1 = arith.constant 0 : i32
    return %c0_i32, %c0_i32_0 : i32, i32
  }
  func.func @transform_5(%arg0: i32) -> (i32, i32) {
    %c0_i32 = arith.constant 0 : i32
    %c0_i32_0 = arith.constant 0 : i32
    %c0_i32_1 = arith.constant 0 : i32
    return %c0_i32, %c0_i32_0 : i32, i32
  }
  func.func @transform_6(%arg0: i32) -> (i32, i32) {
    %c0_i32 = arith.constant 0 : i32
    %c0_i32_0 = arith.constant 0 : i32
    return %arg0, %c0_i32 : i32, i32
  }
}

</mosaic_0001>

<bundles_post_ra>
// kernel: tpu_custom_call.1
= control target key start
LH: loop header
LB: loop body
LE: loop exit
PB: predicated region body
PF: predicated region fallthrough
CT: control target
= control target key end

     0   :  { %vm1239_vm0 = vcmask 130048   ;;  %s4560_s0 = inlined_call_operand.vmem [shape: bf16[8,784], index: 0, kind: input, shape index: {}]   ;;  %s4561_s1 = inlined_call_operand.vmem [shape: bf16[784,392], index: 1, kind: input, shape index: {}]   ;;  %s4562_s2 = inlined_call_operand.vmem [shape: f32[1,392], index: 2, kind: input, shape index: {}]   ;;  %s4563_s3 = inlined_call_operand.vmem [shape: f32[4,392], index: 3, kind: input, shape index: {}]   ;;  %s4564_s4 = inlined_call_operand.vmem [shape: bf16[392,10], index: 4, kind: input, shape index: {}]   ;;  %s4565_s5 = inlined_call_operand.vmem [shape: f32[1,10], index: 5, kind: input, shape index: {}]   ;;  %s4566_s6 = inlined_call_operand.hbm [shape: f32[8,10], index: 6, kind: output, shape index: {}]  }
   0x1   :  { %v2120_v0 = vld [vmem:[%s4561_s1 + $0xe0] sm:$0xf]  ;;  %v2921_v1 = vld [vmem:[%s4561_s1 + $0xec] sm:$0xf0] }
   0x2   :  { %v2248_v2 = vld [vmem:[%s4561_s1 + $0x1e0] sm:$0xf]  ;;  %v2121_v3 = vor.u32 %v2921_v1, %v2120_v0  ;;  %v2953_v4 = vld [vmem:[%s4561_s1 + $0x1ec] sm:$0xf0] }
   0x3   :  { %v2376_v5 = vld [vmem:[%s4561_s1 + $0x2e0] sm:$0xf]  ;;  %v2985_v6 = vld [vmem:[%s4561_s1 + $0x2ec] sm:$0xf0]  ;;  %v2249_v7 = vor.u32 %v2953_v4, %v2248_v2 }
   0x4   :  { %v2377_v8 = vor.u32 %v2985_v6, %v2376_v5  ;;  %v2504_v9 = vld [vmem:[%s4561_s1 + $0x3e0] sm:$0xf]  ;;  %v3017_v10 = vld [vmem:[%s4561_s1 + $0x3ec] sm:$0xf0]  ;;  %1243 = vmatpush.bf16.msra.mxu0 %v2121_v3 }
   0x5   :  { %v2104_v11 = vld [vmem:[%s4561_s1 + $0xc0] sm:$0xf]  ;;  %v2505_v12 = vor.u32 %v3017_v10, %v2504_v9  ;;  %v2917_v13 = vld [vmem:[%s4561_s1 + $0xcc] sm:$0xf0]  ;;  %1256 = vmatpush.bf16.msra.mxu1 %v2249_v7 }
   0x6   :  { %v2232_v14 = vld [vmem:[%s4561_s1 + $0x1c0] sm:$0xf]  ;;  %v2949_v15 = vld [vmem:[%s4561_s1 + $0x1cc] sm:$0xf0]  ;;  %1269 = vmatpush.bf16.msra.mxu2 %v2377_v8  ;;  %v2105_v16 = vor.u32 %v2917_v13, %v2104_v11 }
   0x7   :  { %v2233_v17 = vor.u32 %v2949_v15, %v2232_v14  ;;  %v2360_v18 = vld [vmem:[%s4561_s1 + $0x2c0] sm:$0xf]  ;;  %v2981_v19 = vld [vmem:[%s4561_s1 + $0x2cc] sm:$0xf0]  ;;  %1282 = vmatpush.bf16.msra.mxu3 %v2505_v12 }
   0x8   :  { %v2488_v20 = vld [vmem:[%s4561_s1 + $0x3c0] sm:$0xf]  ;;  %v2361_v21 = vor.u32 %v2981_v19, %v2360_v18  ;;  %v3013_v22 = vld [vmem:[%s4561_s1 + $0x3cc] sm:$0xf0]  ;;  %1244 = vmatpush.bf16.msra.mxu0 %v2105_v16 }
   0x9   :  { %v2088_v23 = vld [vmem:[%s4561_s1 + $0xa0] sm:$0xf]  ;;  %v2913_v24 = vld [vmem:[%s4561_s1 + $0xac] sm:$0xf0]  ;;  %v2489_v25 = vor.u32 %v3013_v22, %v2488_v20  ;;  %1257 = vmatpush.bf16.msra.mxu1 %v2233_v17 }
   0xa   :  { %v2216_v26 = vld [vmem:[%s4561_s1 + $0x1a0] sm:$0xf]  ;;  %v2945_v27 = vld [vmem:[%s4561_s1 + $0x1ac] sm:$0xf0]  ;;  %v2089_v29 = vor.u32 %v2913_v24, %v2088_v23  ;;  %1270 = vmatpush.bf16.msra.mxu2 %v2361_v21 }
   0xb   :  { %v2344_v28 = vld [vmem:[%s4561_s1 + $0x2a0] sm:$0xf]  ;;  %v2977_v30 = vld [vmem:[%s4561_s1 + $0x2ac] sm:$0xf0]  ;;  %v2217_v33 = vor.u32 %v2945_v27, %v2216_v26  ;;  %1283 = vmatpush.bf16.msra.mxu3 %v2489_v25  ;;  %v26_v25 = vld [vmem:[%s4560_s0 + $0x8] sm:$0xff] }
   0xc   :  { %v2472_v31 = vld [vmem:[%s4561_s1 + $0x3a0] sm:$0xf]  ;;  %v3009_v32 = vld [vmem:[%s4561_s1 + $0x3ac] sm:$0xf0]  ;;  %v2345_v34 = vor.u32 %v2977_v30, %v2344_v28  ;;  %1245 = vmatpush.bf16.msra.mxu0 %v2089_v29 }
   0xd   :  { %v2072_v35 = vld [vmem:[%s4561_s1 + $0x80] sm:$0xf]  ;;  %v2909_v36 = vld [vmem:[%s4561_s1 + $0x8c] sm:$0xf0]  ;;  %v2473_v38 = vor.u32 %v3009_v32, %v2472_v31  ;;  %1258 = vmatpush.bf16.msra.mxu1 %v2217_v33 }
   0xe   :  { %v2200_v37 = vld [vmem:[%s4561_s1 + $0x180] sm:$0xf]  ;;  %v2941_v39 = vld [vmem:[%s4561_s1 + $0x18c] sm:$0xf0]  ;;  %v2073_v44 = vor.u32 %v2909_v36, %v2072_v35  ;;  %1271 = vmatpush.bf16.msra.mxu2 %v2345_v34  ;;  %v2919_v34 = vld [vmem:[%s4561_s1 + $0xe4] sm:$0xf]  ;;  %v241_v36 = vunpack.c.l.b16 %v26_v25 }
   0xf   :  { %v2328_v40 = vld [vmem:[%s4561_s1 + $0x280] sm:$0xf]  ;;  %v2973_v41 = vld [vmem:[%s4561_s1 + $0x28c] sm:$0xf0]  ;;  %v2201_v45 = vor.u32 %v2941_v39, %v2200_v37  ;;  %1284 = vmatpush.bf16.msra.mxu3 %v2473_v38  ;;  %v2122_v35 = vld [vmem:[%s4561_s1 + $0xf0] sm:$0xf0] }
  0x10   :  { %v2456_v42 = vld [vmem:[%s4561_s1 + $0x380] sm:$0xf]  ;;  %v3005_v43 = vld [vmem:[%s4561_s1 + $0x38c] sm:$0xf0]  ;;  %v2329_v46 = vor.u32 %v2973_v41, %v2328_v40  ;;  %1246 = vmatpush.bf16.msra.mxu0 %v2073_v44 }
  0x11   :  { %v2056_v47 = vld [vmem:[%s4561_s1 + $0x60] sm:$0xf]  ;;  %v2905_v48 = vld [vmem:[%s4561_s1 + $0x6c] sm:$0xf0]  ;;  %v2457_v50 = vor.u32 %v3005_v43, %v2456_v42  ;;  %1259 = vmatpush.bf16.msra.mxu1 %v2201_v45  ;;  %v242_v42 = vunpack.c.h.b16 %v26_v25  ;;  %v2939_v25 = vld [vmem:[%s4561_s1 + $0x184] sm:$0xf] }
  0x12   :  { %v2184_v49 = vld [vmem:[%s4561_s1 + $0x160] sm:$0xf]  ;;  %v2937_v51 = vld [vmem:[%s4561_s1 + $0x16c] sm:$0xf0]  ;;  %v2057_v56 = vor.u32 %v2905_v48, %v2056_v47  ;;  %1272 = vmatpush.bf16.msra.mxu2 %v2329_v46  ;;  %v2951_v46 = vld [vmem:[%s4561_s1 + $0x1e4] sm:$0xf] }
  0x13   :  { %v2312_v52 = vld [vmem:[%s4561_s1 + $0x260] sm:$0xf]  ;;  %v2969_v53 = vld [vmem:[%s4561_s1 + $0x26c] sm:$0xf0]  ;;  %v2185_v57 = vor.u32 %v2937_v51, %v2184_v49  ;;  %1285 = vmatpush.bf16.msra.mxu3 %v2457_v50  ;;  %v2250_v47 = vld [vmem:[%s4561_s1 + $0x1f0] sm:$0xf0]  ;;  %v2125_v49 = vor.u32 %v2919_v34, %v2122_v35 }
  0x14   :  { %v2440_v54 = vld [vmem:[%s4561_s1 + $0x360] sm:$0xf]  ;;  %v3001_v55 = vld [vmem:[%s4561_s1 + $0x36c] sm:$0xf0]  ;;  %v2313_v58 = vor.u32 %v2969_v53, %v2312_v52  ;;  %1247 = vmatpush.bf16.msra.mxu0 %v2057_v56  ;;  %v3432_v53 = vpack.c.b16 %v241_v36, %v241_v36  ;;  %v2106_v56 = vld [vmem:[%s4561_s1 + $0xd0] sm:$0xf0] }
  0x15   :  { %v2040_v59 = vld [vmem:[%s4561_s1 + $0x40] sm:$0xf]  ;;  %v2901_v60 = vld [vmem:[%s4561_s1 + $0x4c] sm:$0xf0]  ;;  %v2441_v62 = vor.u32 %v3001_v55, %v2440_v54  ;;  %1260 = vmatpush.bf16.msra.mxu1 %v2185_v57  ;;  %v2915_v55 = vld [vmem:[%s4561_s1 + $0xc4] sm:$0xf] }
  0x16   :  { %v2168_v61 = vld [vmem:[%s4561_s1 + $0x140] sm:$0xf]  ;;  %v2933_v63 = vld [vmem:[%s4561_s1 + $0x14c] sm:$0xf0]  ;;  %v2041_v4 = vor.u32 %v2901_v60, %v2040_v59  ;;  %1273 = vmatpush.bf16.msra.mxu2 %v2313_v58  ;;  %v3445_v60 = vpack.c.b16 %v242_v42, %v242_v42  ;;  %v2058_v34 = vld [vmem:[%s4561_s1 + $0x70] sm:$0xf0] }
  0x17   :  { %v2296_v0 = vld [vmem:[%s4561_s1 + $0x240] sm:$0xf]  ;;  %v2965_v1 = vld [vmem:[%s4561_s1 + $0x24c] sm:$0xf0]  ;;  %v2169_v5 = vor.u32 %v2933_v63, %v2168_v61  ;;  %1286 = vmatpush.bf16.msra.mxu3 %v2441_v62  ;;  %v2253_v61 = vor.u32 %v2951_v46, %v2250_v47  ;;  %v2947_v63 = vld [vmem:[%s4561_s1 + $0x1c4] sm:$0xf] }
  0x18   :  { %v2424_v2 = vld [vmem:[%s4561_s1 + $0x340] sm:$0xf]  ;;  %v2997_v3 = vld [vmem:[%s4561_s1 + $0x34c] sm:$0xf0]  ;;  %v2297_v6 = vor.u32 %v2965_v1, %v2296_v0  ;;  %1248 = vmatpush.bf16.msra.mxu0 %v2041_v4  ;;  %v2234_v0 = vld [vmem:[%s4561_s1 + $0x1d0] sm:$0xf0] }
  0x19   :  { %v2024_v7 = vld [vmem:[%s4561_s1 + $0x20] sm:$0xf]  ;;  %v2897_v8 = vld [vmem:[%s4561_s1 + $0x2c] sm:$0xf0]  ;;  %v2425_v10 = vor.u32 %v2997_v3, %v2424_v2  ;;  %1261 = vmatpush.bf16.msra.mxu1 %v2169_v5  ;;  %v2109_v2 = vor.u32 %v2915_v55, %v2106_v56  ;;  %v2899_v46 = vld [vmem:[%s4561_s1 + $0x44] sm:$0xf] }
  0x1a   :  { %v2152_v9 = vld [vmem:[%s4561_s1 + $0x120] sm:$0xf]  ;;  %v2929_v11 = vld [vmem:[%s4561_s1 + $0x12c] sm:$0xf0]  ;;  %v2025_v17 = vor.u32 %v2897_v8, %v2024_v7  ;;  %1274 = vmatpush.bf16.msra.mxu2 %v2297_v6  ;;  %v2911_v7 = vld [vmem:[%s4561_s1 + $0xa4] sm:$0xf] }
  0x1b   :  { %v2280_v12 = vld [vmem:[%s4561_s1 + $0x220] sm:$0xf]  ;;  %v2961_v13 = vld [vmem:[%s4561_s1 + $0x22c] sm:$0xf0]  ;;  %v2153_v21 = vor.u32 %v2929_v11, %v2152_v9  ;;  %1287 = vmatpush.bf16.msra.mxu3 %v2425_v10  ;;  %v2090_v8 = vld [vmem:[%s4561_s1 + $0xb0] sm:$0xf0]  ;;  %v2237_v10 = vor.u32 %v2947_v63, %v2234_v0 }
  0x1c   :  { %v2408_v14 = vld [vmem:[%s4561_s1 + $0x320] sm:$0xf]  ;;  %v2993_v15 = vld [vmem:[%s4561_s1 + $0x32c] sm:$0xf0]  ;;  %v2281_v22 = vor.u32 %v2961_v13, %v2280_v12  ;;  %1249 = vmatpush.bf16.msra.mxu0 %v2025_v17  ;;  %v2943_v12 = vld [vmem:[%s4561_s1 + $0x1a4] sm:$0xf] }
  0x1d   :  { %v2008_v16 = vld [vmem:[%s4561_s1] sm:$0xf]  ;;  %v2893_v18 = vld [vmem:[%s4561_s1 + $0xc] sm:$0xf0]  ;;  %v2409_v26 = vor.u32 %v2993_v15, %v2408_v14  ;;  %1262 = vmatpush.bf16.msra.mxu1 %v2153_v21  ;;  %v2218_v13 = vld [vmem:[%s4561_s1 + $0x1b0] sm:$0xf0]  ;;  %v2093_v15 = vor.u32 %v2911_v7, %v2090_v8 }
  0x1e   :  { %v2136_v19 = vld [vmem:[%s4561_s1 + $0x100] sm:$0xf]  ;;  %v2925_v20 = vld [vmem:[%s4561_s1 + $0x10c] sm:$0xf0]  ;;  %v2009_v33 = vor.u32 %v2893_v18, %v2008_v16  ;;  %1275 = vmatpush.bf16.msra.mxu2 %v2281_v22  ;;  %v2074_v21 = vld [vmem:[%s4561_s1 + $0x90] sm:$0xf0] }
  0x1f   :  { %v2264_v23 = vld [vmem:[%s4561_s1 + $0x200] sm:$0xf]  ;;  %v2957_v24 = vld [vmem:[%s4561_s1 + $0x20c] sm:$0xf0]  ;;  %v2137_v38 = vor.u32 %v2925_v20, %v2136_v19  ;;  %1288 = vmatpush.bf16.msra.mxu3 %v2409_v26  ;;  %v2907_v20 = vld [vmem:[%s4561_s1 + $0x84] sm:$0xf] }
  0x20   :  { %v2392_v27 = vld [vmem:[%s4561_s1 + $0x300] sm:$0xf]  ;;  %v2989_v28 = vld [vmem:[%s4561_s1 + $0x30c] sm:$0xf0]  ;;  %v2265_v39 = vor.u32 %v2957_v24, %v2264_v23  ;;  %1250 = vmatpush.bf16.msra.mxu0 %v2009_v33  ;;  %v28_v22 = vld [vmem:[%s4560_s0 + $0x18] sm:$0xf]  ;;  %v2221_v23 = vor.u32 %v2943_v12, %v2218_v13 }
  0x21   :  { %v2632_v29 = vld [vmem:[%s4561_s1 + $0x4e0] sm:$0xf]  ;;  %v3049_v30 = vld [vmem:[%s4561_s1 + $0x4ec] sm:$0xf0]  ;;  %v2393_v43 = vor.u32 %v2989_v28, %v2392_v27  ;;  %1263 = vmatpush.bf16.msra.mxu1 %v2137_v38  ;;  %v2202_v26 = vld [vmem:[%s4561_s1 + $0x190] sm:$0xf0]  ;;  %v2077_v28 = vor.u32 %v2907_v20, %v2074_v21  ;;  %v245_v35 = vunpack.c.l.b16 %v28_v22 }
  0x22   :  { %v2760_v31 = vld [vmem:[%s4561_s1 + $0x5e0] sm:$0xf]  ;;  %v3081_v32 = vld [vmem:[%s4561_s1 + $0x5ec] sm:$0xf0]  ;;  %v2633_v44 = vor.u32 %v3049_v30, %v2632_v29  ;;  %1276 = vmatpush.bf16.msra.mxu2 %v2265_v39  ;;  %v2903_v33 = vld [vmem:[%s4561_s1 + $0x64] sm:$0xf]  ;;  %v2205_v36 = vor.u32 %v2939_v25, %v2202_v26 }
  0x23   :  { %v25_v37 = vld [vmem:[%s4560_s0] sm:$0xff]  ;;  %v3085_v45 = vld [vmem:[%s4561_s1 + $0x60c] sm:$0xf0]  ;;  %v2761_v48 = vor.u32 %v3081_v32, %v2760_v31  ;;  %1289 = vmatpush.bf16.msra.mxu3 %v2393_v43  ;;  %v2186_v39 = vld [vmem:[%s4561_s1 + $0x170] sm:$0xf0] }
  0x24   :  { %v2776_v40 = vld [vmem:[%s4561_s1 + $0x600] sm:$0xf]  ;;  %v239_v41 = vunpack.c.l.b16 %v25_v37  ;;  %v3045_v51 = vld [vmem:[%s4561_s1 + $0x4cc] sm:$0xf0]  ;;  %v240_v58 = vunpack.c.h.b16 %v25_v37  ;;  %1295 = vmatpush.bf16.msrb.mxu0 %v2633_v44  ;;  %v2935_v38 = vld [vmem:[%s4561_s1 + $0x164] sm:$0xf] }
  0x25   :  { %v2616_v50 = vld [vmem:[%s4561_s1 + $0x4c0] sm:$0xf]  ;;  %v3077_v54 = vld [vmem:[%s4561_s1 + $0x5cc] sm:$0xf0]  ;;  %v2777_v59 = vor.u32 %v3085_v45, %v2776_v40  ;;  %1308 = vmatpush.bf16.msrb.mxu1 %v2761_v48  ;;  %1277 = vmatmul.bf16.vlgmr.msra.gmra.mxu2 %v3432_v53  ;;  %v2042_v47 = vld [vmem:[%s4561_s1 + $0x50] sm:$0xf0]  ;;  %v3552_v48 = vpack.c.b16 %v245_v35, %v245_v35 }
  0x26   :  { %v2744_v52 = vld [vmem:[%s4561_s1 + $0x5c0] sm:$0xf]  ;;  %v3443_v57 = vpack.c.b16 %v239_v41, %v239_v41  ;;  %v2617_v62 = vor.u32 %v3045_v51, %v2616_v50  ;;  %v3041_v4 = vld [vmem:[%s4561_s1 + $0x4ac] sm:$0xf0]  ;;  %v3473_v9 = vpack.c.b16 %v240_v58, %v240_v58  ;;  %1290 = vmatmul.bf16.vlgmr.msra.gmra.mxu3 %v3445_v60  ;;  %v2061_v41 = vor.u32 %v2903_v33, %v2058_v34  ;;  %v2931_v51 = vld [vmem:[%s4561_s1 + $0x144] sm:$0xf] }
  0x27   :  { %1334 = vmatpush.bf16.msrb.mxu3 %v2125_v49  ;;  %v2745_v1 = vor.u32 %v3077_v54, %v2744_v52  ;;  %v2600_v3 = vld [vmem:[%s4561_s1 + $0x4a0] sm:$0xf]  ;;  %v3073_v6 = vld [vmem:[%s4561_s1 + $0x5ac] sm:$0xf0]  ;;  %1328 = vmatpush.bf16.msrb.mxu2 %v2777_v59  ;;  %v2189_v49 = vor.u32 %v2935_v38, %v2186_v39  ;;  %v2170_v52 = vld [vmem:[%s4561_s1 + $0x150] sm:$0xf0]  ;;  %v2045_v55 = vor.u32 %v2899_v46, %v2042_v47 }
  0x28   :  { %v2728_v5 = vld [vmem:[%s4561_s1 + $0x5a0] sm:$0xf]  ;;  %1251 = vmatmul.bf16.vlgmr.msra.gmra.mxu0 %v3443_v57  ;;  %v2601_v11 = vor.u32 %v3041_v4, %v2600_v3  ;;  %v3037_v17 = vld [vmem:[%s4561_s1 + $0x48c] sm:$0xf0]  ;;  %1264 = vmatmul.bf16.vlgmr.msra.gmra.mxu1 %v3473_v9  ;;  %v2026_v63 = vld [vmem:[%s4561_s1 + $0x30] sm:$0xf0] }
  0x29   :  { %1296 = vmatpush.bf16.msrb.mxu0 %v2617_v62  ;;  %1309 = vmatpush.bf16.msrb.mxu1 %v2745_v1  ;;  %v2729_v14 = vor.u32 %v3073_v6, %v2728_v5  ;;  %v2584_v16 = vld [vmem:[%s4561_s1 + $0x480] sm:$0xf]  ;;  %v3069_v19 = vld [vmem:[%s4561_s1 + $0x58c] sm:$0xf0]  ;;  %v2895_v62 = vld [vmem:[%s4561_s1 + $0x24] sm:$0xf]  ;;  %v2173_v1 = vor.u32 %v2931_v51, %v2170_v52 }
  0x2a   :  { %v2712_v18 = vld [vmem:[%s4561_s1 + $0x580] sm:$0xf]  ;;  %v2585_v24 = vor.u32 %v3037_v17, %v2584_v16  ;;  %v3033_v30 = vld [vmem:[%s4561_s1 + $0x46c] sm:$0xf0]  ;;  %v2927_v0 = vld [vmem:[%s4561_s1 + $0x124] sm:$0xf]  ;;  %v2029_v7 = vor.u32 %v2895_v62, %v2026_v63 }
  0x2b   :  { %1347 = vmatpush.bf16.msra.mxu2 %v2253_v61  ;;  %1335 = vmatpush.bf16.msrb.mxu3 %v2109_v2  ;;  %v2713_v27 = vor.u32 %v3069_v19, %v2712_v18  ;;  %v2568_v29 = vld [vmem:[%s4561_s1 + $0x460] sm:$0xf]  ;;  %v3065_v32 = vld [vmem:[%s4561_s1 + $0x56c] sm:$0xf0]  ;;  %v2154_v3 = vld [vmem:[%s4561_s1 + $0x130] sm:$0xf0] }
  0x2c   :  { %v2696_v31 = vld [vmem:[%s4561_s1 + $0x560] sm:$0xf]  ;;  %v2569_v37 = vor.u32 %v3033_v30, %v2568_v29  ;;  %v3029_v43 = vld [vmem:[%s4561_s1 + $0x44c] sm:$0xf0]  ;;  %v2891_v12 = vld [vmem:[%s4561_s1 + $0x4] sm:$0xf]  ;;  %v2157_v19 = vor.u32 %v2927_v0, %v2154_v3 }
  0x2d   :  { %1297 = vmatpush.bf16.msrb.mxu0 %v2601_v11  ;;  %1310 = vmatpush.bf16.msrb.mxu1 %v2729_v14  ;;  %v2697_v40 = vor.u32 %v3065_v32, %v2696_v31  ;;  %v2552_v42 = vld [vmem:[%s4561_s1 + $0x440] sm:$0xf]  ;;  %v3061_v45 = vld [vmem:[%s4561_s1 + $0x54c] sm:$0xf0]  ;;  %v2010_v13 = vld [vmem:[%s4561_s1 + $0x10] sm:$0xf0] }
  0x2e   :  { %v2680_v44 = vld [vmem:[%s4561_s1 + $0x540] sm:$0xf]  ;;  %v2553_v50 = vor.u32 %v3029_v43, %v2552_v42  ;;  %v3025_v58 = vld [vmem:[%s4561_s1 + $0x42c] sm:$0xf0]  ;;  %v2983_v14 = vld [vmem:[%s4561_s1 + $0x2e4] sm:$0xf]  ;;  %v2013_v25 = vor.u32 %v2891_v12, %v2010_v13 }
  0x2f   :  { %1348 = vmatpush.bf16.msra.mxu2 %v2237_v10  ;;  %1336 = vmatpush.bf16.msrb.mxu3 %v2093_v15  ;;  %v2681_v54 = vor.u32 %v3061_v45, %v2680_v44  ;;  %v2536_v56 = vld [vmem:[%s4561_s1 + $0x420] sm:$0xf]  ;;  %v3057_v61 = vld [vmem:[%s4561_s1 + $0x52c] sm:$0xf0]  ;;  %v2378_v15 = vld [vmem:[%s4561_s1 + $0x2f0] sm:$0xf0] }
  0x30   :  { %v2664_v59 = vld [vmem:[%s4561_s1 + $0x520] sm:$0xf]  ;;  %v2537_v2 = vor.u32 %v3025_v58, %v2536_v56  ;;  %v27_v5 = vld [vmem:[%s4560_s0 + $0x10] sm:$0xff]  ;;  %v3015_v16 = vld [vmem:[%s4561_s1 + $0x3e4] sm:$0xf] }
  0x31   :  { %1298 = vmatpush.bf16.msrb.mxu0 %v2585_v24  ;;  %1311 = vmatpush.bf16.msrb.mxu1 %v2713_v27  ;;  %v2520_v4 = vld [vmem:[%s4561_s1 + $0x400] sm:$0xf]  ;;  %v2665_v6 = vor.u32 %v3057_v61, %v2664_v59  ;;  %v3021_v8 = vld [vmem:[%s4561_s1 + $0x40c] sm:$0xf0]  ;;  %v2506_v17 = vld [vmem:[%s4561_s1 + $0x3f0] sm:$0xf0]  ;;  %v243_v18 = vunpack.c.l.b16 %v27_v5 }
  0x32   :  { %v2648_v10 = vld [vmem:[%s4561_s1 + $0x500] sm:$0xf]  ;;  %v3053_v11 = vld [vmem:[%s4561_s1 + $0x50c] sm:$0xf0]  ;;  %v2521_v20 = vor.u32 %v3021_v8, %v2520_v4  ;;  %v3047_v21 = vld [vmem:[%s4561_s1 + $0x4e4] sm:$0xf]  ;;  %v2509_v29 = vor.u32 %v3015_v16, %v2506_v17 }
  0x33   :  { %1349 = vmatpush.bf16.msra.mxu2 %v2221_v23  ;;  %1337 = vmatpush.bf16.msrb.mxu3 %v2077_v28  ;;  %v2634_v22 = vld [vmem:[%s4561_s1 + $0x4f0] sm:$0xf0]  ;;  %v244_v23 = vunpack.c.h.b16 %v27_v5  ;;  %v2649_v24 = vor.u32 %v3053_v11, %v2648_v10  ;;  %v2923_v26 = vld [vmem:[%s4561_s1 + $0x104] sm:$0xf]  ;;  %v2381_v28 = vor.u32 %v2983_v14, %v2378_v15  ;;  %v3640_v34 = vpack.c.b16 %v243_v18, %v243_v18 }
  0x34   :  { %v2138_v27 = vld [vmem:[%s4561_s1 + $0x110] sm:$0xf0]  ;;  %v3079_v30 = vld [vmem:[%s4561_s1 + $0x5e4] sm:$0xf]  ;;  %v2637_v33 = vor.u32 %v3047_v21, %v2634_v22 }
  0x35   :  { %1299 = vmatpush.bf16.msrb.mxu0 %v2569_v37  ;;  %1312 = vmatpush.bf16.msrb.mxu1 %v2697_v40  ;;  %v2762_v31 = vld [vmem:[%s4561_s1 + $0x5f0] sm:$0xf0]  ;;  %v2979_v32 = vld [vmem:[%s4561_s1 + $0x2c4] sm:$0xf]  ;;  %v2141_v38 = vor.u32 %v2923_v26, %v2138_v27  ;;  %v3651_v39 = vpack.c.b16 %v244_v23, %v244_v23 }
  0x36   :  { %2790 = vmatmul.msk.bf16.vlgmr.msrb.gmra.mxu2 %vm1239_vm0, %v3552_v48  ;;  %v2362_v35 = vld [vmem:[%s4561_s1 + $0x2d0] sm:$0xf0]  ;;  %v3043_v40 = vld [vmem:[%s4561_s1 + $0x4c4] sm:$0xf]  ;;  %v2765_v42 = vor.u32 %v3079_v30, %v2762_v31 }
  0x37   :  { %1350 = vmatpush.bf16.msra.mxu2 %v2205_v36  ;;  %1338 = vmatpush.bf16.msrb.mxu3 %v2061_v41  ;;  %v3011_v36 = vld [vmem:[%s4561_s1 + $0x3c4] sm:$0xf]  ;;  %v2490_v37 = vld [vmem:[%s4561_s1 + $0x3d0] sm:$0xf0]  ;;  %v2365_v43 = vor.u32 %v2979_v32, %v2362_v35 }
  0x38   :  { %v2618_v41 = vld [vmem:[%s4561_s1 + $0x4d0] sm:$0xf0]  ;;  %v2493_v44 = vor.u32 %v3011_v36, %v2490_v37  ;;  %v3075_v45 = vld [vmem:[%s4561_s1 + $0x5c4] sm:$0xf] }
  0x39   :  { %1300 = vmatpush.bf16.msrb.mxu0 %v2553_v50  ;;  %1313 = vmatpush.bf16.msrb.mxu1 %v2681_v54  ;;  %v2746_v46 = vld [vmem:[%s4561_s1 + $0x5d0] sm:$0xf0]  ;;  %v2975_v47 = vld [vmem:[%s4561_s1 + $0x2a4] sm:$0xf] }
  0x3a   :  { %v2346_v50 = vld [vmem:[%s4561_s1 + $0x2b0] sm:$0xf0]  ;;  %v3007_v51 = vld [vmem:[%s4561_s1 + $0x3a4] sm:$0xf]  ;;  %v2749_v56 = vor.u32 %v3075_v45, %v2746_v46 }
  0x3b   :  { %1351 = vmatpush.bf16.msra.mxu2 %v2189_v49  ;;  %1339 = vmatpush.bf16.msrb.mxu3 %v2045_v55  ;;  %v2621_v49 = vor.u32 %v3043_v40, %v2618_v41  ;;  %v2474_v52 = vld [vmem:[%s4561_s1 + $0x3b0] sm:$0xf0]  ;;  %v3039_v54 = vld [vmem:[%s4561_s1 + $0x4a4] sm:$0xf]  ;;  %v2349_v58 = vor.u32 %v2975_v47, %v2346_v50 }
  0x3c   :  { %v2602_v55 = vld [vmem:[%s4561_s1 + $0x4b0] sm:$0xf0]  ;;  %v2477_v59 = vor.u32 %v3007_v51, %v2474_v52  ;;  %v3071_v61 = vld [vmem:[%s4561_s1 + $0x5a4] sm:$0xf] }
  0x3d   :  { %1301 = vmatpush.bf16.msrb.mxu0 %v2537_v2  ;;  %1314 = vmatpush.bf16.msrb.mxu1 %v2665_v6  ;;  %v2730_v62 = vld [vmem:[%s4561_s1 + $0x5b0] sm:$0xf0]  ;;  %v2971_v63 = vld [vmem:[%s4561_s1 + $0x284] sm:$0xf]  ;;  %v2605_v0 = vor.u32 %v3039_v54, %v2602_v55 }
  0x3e   :  { %v3003_v2 = vld [vmem:[%s4561_s1 + $0x384] sm:$0xf]  ;;  %v2458_v3 = vld [vmem:[%s4561_s1 + $0x390] sm:$0xf0]  ;;  %v2733_v6 = vor.u32 %v3071_v61, %v2730_v62 }
  0x3f   :  { %1352 = vmatpush.bf16.msra.mxu2 %v2173_v1  ;;  %1340 = vmatpush.bf16.msrb.mxu3 %v2029_v7  ;;  %v2330_v1 = vld [vmem:[%s4561_s1 + $0x290] sm:$0xf0]  ;;  %v3035_v4 = vld [vmem:[%s4561_s1 + $0x484] sm:$0xf]  ;;  %v2461_v8 = vor.u32 %v3003_v2, %v2458_v3 }
  0x40   :  { %v2586_v5 = vld [vmem:[%s4561_s1 + $0x490] sm:$0xf0]  ;;  %v2333_v7 = vor.u32 %v2971_v63, %v2330_v1  ;;  %v3067_v10 = vld [vmem:[%s4561_s1 + $0x584] sm:$0xf] }
  0x41   :  { %1302 = vmatpush.bf16.msrb.mxu0 %v2521_v20  ;;  %1315 = vmatpush.bf16.msrb.mxu1 %v2649_v24  ;;  %v2714_v11 = vld [vmem:[%s4561_s1 + $0x590] sm:$0xf0]  ;;  %v2967_v12 = vld [vmem:[%s4561_s1 + $0x264] sm:$0xf]  ;;  %v2589_v13 = vor.u32 %v3035_v4, %v2586_v5 }
  0x42   :  { %v2314_v14 = vld [vmem:[%s4561_s1 + $0x270] sm:$0xf0]  ;;  %v2999_v15 = vld [vmem:[%s4561_s1 + $0x364] sm:$0xf] }
  0x43   :  { %1353 = vmatpush.bf16.msra.mxu2 %v2157_v19  ;;  %1341 = vmatpush.bf16.msrb.mxu3 %v2013_v25  ;;  %v2442_v16 = vld [vmem:[%s4561_s1 + $0x370] sm:$0xf0]  ;;  %v3031_v17 = vld [vmem:[%s4561_s1 + $0x464] sm:$0xf]  ;;  %v2717_v19 = vor.u32 %v3067_v10, %v2714_v11  ;;  %v2317_v20 = vor.u32 %v2967_v12, %v2314_v14 }
  0x44   :  { %1303 = vmatmul.bf16.vlgmr.msrb.gmra.mxu0 %v3640_v34  ;;  %1316 = vmatmul.bf16.vlgmr.msrb.gmra.mxu1 %v3651_v39  ;;  %v2570_v18 = vld [vmem:[%s4561_s1 + $0x470] sm:$0xf0]  ;;  %v2445_v21 = vor.u32 %v2999_v15, %v2442_v16  ;;  %v3063_v22 = vld [vmem:[%s4561_s1 + $0x564] sm:$0xf] }
  0x45   :  { %1360 = vmatpush.bf16.msra.mxu0 %v2381_v28  ;;  %1373 = vmatpush.bf16.msra.mxu1 %v2509_v29  ;;  %v2698_v23 = vld [vmem:[%s4561_s1 + $0x570] sm:$0xf0]  ;;  %v2963_v24 = vld [vmem:[%s4561_s1 + $0x244] sm:$0xf]  ;;  %v2573_v25 = vor.u32 %v3031_v17, %v2570_v18 }
  0x46   :  { %1342 = vmatmul.bf16.vlgmr.msrb.gmra.mxu3 %v3443_v57  ;;  %v2298_v26 = vld [vmem:[%s4561_s1 + $0x250] sm:$0xf0]  ;;  %v2995_v27 = vld [vmem:[%s4561_s1 + $0x344] sm:$0xf]  ;;  %v2701_v31 = vor.u32 %v3063_v22, %v2698_v23 }
  0x47   :  { %1386 = vmatpush.bf16.msra.mxu3 %v2637_v33  ;;  %1354 = vmatpush.bf16.msra.mxu2 %v2141_v38  ;;  %v2426_v28 = vld [vmem:[%s4561_s1 + $0x350] sm:$0xf0]  ;;  %v3027_v29 = vld [vmem:[%s4561_s1 + $0x444] sm:$0xf]  ;;  %v2301_v32 = vor.u32 %v2963_v24, %v2298_v26 }
  0x48   :  { %v2554_v30 = vld [vmem:[%s4561_s1 + $0x450] sm:$0xf0]  ;;  %v2429_v33 = vor.u32 %v2995_v27, %v2426_v28  ;;  %v3059_v35 = vld [vmem:[%s4561_s1 + $0x544] sm:$0xf] }
  0x49   :  { %1361 = vmatpush.bf16.msra.mxu0 %v2365_v43  ;;  %1374 = vmatpush.bf16.msra.mxu1 %v2493_v44  ;;  %v2682_v36 = vld [vmem:[%s4561_s1 + $0x550] sm:$0xf0]  ;;  %v2959_v37 = vld [vmem:[%s4561_s1 + $0x224] sm:$0xf]  ;;  %v2557_v38 = vor.u32 %v3027_v29, %v2554_v30 }
  0x4a   :  { %1355 = vmatmul.bf16.vlgmr.msra.gmra.mxu2 %v3473_v9  ;;  %v2282_v40 = vld [vmem:[%s4561_s1 + $0x230] sm:$0xf0]  ;;  %v2991_v41 = vld [vmem:[%s4561_s1 + $0x324] sm:$0xf]  ;;  %v2685_v46 = vor.u32 %v3059_v35, %v2682_v36 }
  0x4b   :  { %1399 = vmatpush.bf16.msrb.mxu2 %v2765_v42  ;;  %1387 = vmatpush.bf16.msra.mxu3 %v2621_v49  ;;  %v2410_v42 = vld [vmem:[%s4561_s1 + $0x330] sm:$0xf0]  ;;  %v3023_v43 = vld [vmem:[%s4561_s1 + $0x424] sm:$0xf]  ;;  %v2285_v51 = vor.u32 %v2959_v37, %v2282_v40 }
  0x4c   :  { %v2538_v44 = vld [vmem:[%s4561_s1 + $0x430] sm:$0xf0]  ;;  %v3055_v45 = vld [vmem:[%s4561_s1 + $0x524] sm:$0xf]  ;;  %v2413_v52 = vor.u32 %v2991_v41, %v2410_v42 }
  0x4d   :  { %1362 = vmatpush.bf16.msra.mxu0 %v2349_v58  ;;  %1375 = vmatpush.bf16.msra.mxu1 %v2477_v59  ;;  %v2666_v47 = vld [vmem:[%s4561_s1 + $0x530] sm:$0xf0]  ;;  %v2955_v49 = vld [vmem:[%s4561_s1 + $0x204] sm:$0xf]  ;;  %v2541_v58 = vor.u32 %v3023_v43, %v2538_v44 }
  0x4e   :  { %v2266_v50 = vld [vmem:[%s4561_s1 + $0x210] sm:$0xf0]  ;;  %v2987_v54 = vld [vmem:[%s4561_s1 + $0x304] sm:$0xf] }
  0x4f   :  { %1400 = vmatpush.bf16.msrb.mxu2 %v2749_v56  ;;  %1388 = vmatpush.bf16.msra.mxu3 %v2605_v0  ;;  %v2394_v55 = vld [vmem:[%s4561_s1 + $0x310] sm:$0xf0]  ;;  %v3019_v56 = vld [vmem:[%s4561_s1 + $0x404] sm:$0xf] }
  0x50   :  { %v2522_v59 = vld [vmem:[%s4561_s1 + $0x410] sm:$0xf0] }
  0x51   :  { %1363 = vmatpush.bf16.msra.mxu0 %v2333_v7  ;;  %1376 = vmatpush.bf16.msra.mxu1 %v2461_v8 }
  0x53   :  { %1401 = vmatpush.bf16.msrb.mxu2 %v2733_v6  ;;  %1389 = vmatpush.bf16.msra.mxu3 %v2589_v13 }
  0x55   :  { %1364 = vmatpush.bf16.msra.mxu0 %v2317_v20  ;;  %1377 = vmatpush.bf16.msra.mxu1 %v2445_v21 }
  0x57   :  { %1402 = vmatpush.bf16.msrb.mxu2 %v2717_v19  ;;  %1390 = vmatpush.bf16.msra.mxu3 %v2573_v25 }
  0x59   :  { %1365 = vmatpush.bf16.msra.mxu0 %v2301_v32  ;;  %1378 = vmatpush.bf16.msra.mxu1 %v2429_v33 }
  0x5b   :  { %1403 = vmatpush.bf16.msrb.mxu2 %v2701_v31  ;;  %1391 = vmatpush.bf16.msra.mxu3 %v2557_v38 }
  0x5c   :  { %11 = vsyncpa [#allocation3], 0  ;;  %v2128_v61 = vld [vmem:[%s4561_s1 + $0xe8] sm:$0xf]  ;;  %v2922_v62 = vld [vmem:[%s4561_s1 + $0xf4] sm:$0xf0]  ;;  %v2669_v0 = vor.u32 %v3055_v45, %v2666_v47  ;;  %v2269_v4 = vor.u32 %v2955_v49, %v2266_v50  ;;  %v2397_v5 = vor.u32 %v2987_v54, %v2394_v55  ;;  %v2525_v10 = vor.u32 %v3019_v56, %v2522_v59 }
  0x5d   :  { %v2256_v63 = vld [vmem:[%s4561_s1 + $0x1e8] sm:$0xf]  ;;  %v2954_v1 = vld [vmem:[%s4561_s1 + $0x1f4] sm:$0xf0]  ;;  %v3083_v2 = vld [vmem:[%s4561_s1 + $0x604] sm:$0xf]  ;;  %1366 = vmatpush.bf16.msra.mxu0 %v2285_v51  ;;  %1379 = vmatpush.bf16.msra.mxu1 %v2413_v52  ;;  %v2129_v11 = vor.u32 %v2922_v62, %v2128_v61 }
  0x5e   :  { %v2778_v3 = vld [vmem:[%s4561_s1 + $0x610] sm:$0xf0]  ;;  %v3051_v6 = vld [vmem:[%s4561_s1 + $0x504] sm:$0xf]  ;;  %v2384_v8 = vld [vmem:[%s4561_s1 + $0x2e8] sm:$0xf]  ;;  %v2257_v15 = vor.u32 %v2954_v1, %v2256_v63 }
  0x5f   :  { %1404 = vmatpush.bf16.msrb.mxu2 %v2685_v46  ;;  %v2650_v7 = vld [vmem:[%s4561_s1 + $0x510] sm:$0xf0]  ;;  %1392 = vmatpush.bf16.msra.mxu3 %v2541_v58  ;;  %v2986_v12 = vld [vmem:[%s4561_s1 + $0x2f4] sm:$0xf0]  ;;  %v2512_v13 = vld [vmem:[%s4561_s1 + $0x3e8] sm:$0xf]  ;;  %v2781_v16 = vor.u32 %v3083_v2, %v2778_v3 }
  0x60   :  { %v3018_v14 = vld [vmem:[%s4561_s1 + $0x3f4] sm:$0xf0]  ;;  %v2112_v17 = vld [vmem:[%s4561_s1 + $0xc8] sm:$0xf]  ;;  %v2653_v19 = vor.u32 %v3051_v6, %v2650_v7  ;;  %v2385_v22 = vor.u32 %v2986_v12, %v2384_v8  ;;  %vm1919_vm1 = vcmask 1043456   ;;  %vm1915_vm2 = vcmask 64512  }
  0x61   :  { %v2918_v18 = vld [vmem:[%s4561_s1 + $0xd4] sm:$0xf0]  ;;  %v2240_v20 = vld [vmem:[%s4561_s1 + $0x1c8] sm:$0xf]  ;;  %1367 = vmatpush.bf16.msra.mxu0 %v2269_v4  ;;  %1380 = vmatpush.bf16.msra.mxu1 %v2397_v5  ;;  %v2513_v23 = vor.u32 %v3018_v14, %v2512_v13  ;;  %vm1975_vm3 = vcmask 80896   ;;  %s1997_s26 = sshll.u32 %s4566_s6, 4  ;;  %s1998_s26 = int_to_ptr.hbm [resolvable:$true] %s1997_s26 }
  0x62   :  { %v2950_v21 = vld [vmem:[%s4561_s1 + $0x1d4] sm:$0xf0]  ;;  %v2368_v24 = vld [vmem:[%s4561_s1 + $0x2c8] sm:$0xf]  ;;  %v2113_v25 = vor.u32 %v2918_v18, %v2112_v17 }
  0x63   :  { %1405 = vmatpush.bf16.msrb.mxu2 %v2669_v0  ;;  %1393 = vmatpush.bf16.msra.mxu3 %v2525_v10  ;;  %v2982_v26 = vld [vmem:[%s4561_s1 + $0x2d4] sm:$0xf0]  ;;  %v2496_v27 = vld [vmem:[%s4561_s1 + $0x3c8] sm:$0xf]  ;;  %v2241_v29 = vor.u32 %v2950_v21, %v2240_v20 }
  0x64   :  { %v3014_v28 = vld [vmem:[%s4561_s1 + $0x3d4] sm:$0xf0]  ;;  %v2096_v30 = vld [vmem:[%s4561_s1 + $0xa8] sm:$0xf]  ;;  %1368 = vmatmul.bf16.vlgmr.msra.gmra.mxu0 %v3432_v53  ;;  %v2369_v35 = vor.u32 %v2982_v26, %v2368_v24  ;;  %1381 = vmatmul.bf16.vlgmr.msra.gmra.mxu1 %v3445_v60 }
  0x65   :  { %1425 = vmatpush.bf16.msrb.mxu1 %v2129_v11  ;;  %1419 = vmatpush.bf16.msrb.mxu0 %v2781_v16  ;;  %v2914_v31 = vld [vmem:[%s4561_s1 + $0xb4] sm:$0xf0]  ;;  %v2224_v32 = vld [vmem:[%s4561_s1 + $0x1a8] sm:$0xf]  ;;  %v2497_v36 = vor.u32 %v3014_v28, %v2496_v27 }
  0x66   :  { %v2946_v33 = vld [vmem:[%s4561_s1 + $0x1b4] sm:$0xf0]  ;;  %v2352_v37 = vld [vmem:[%s4561_s1 + $0x2a8] sm:$0xf]  ;;  %1394 = vmatmul.bf16.vlgmr.msra.gmra.mxu3 %v3640_v34  ;;  %v2097_v38 = vor.u32 %v2914_v31, %v2096_v30 }
  0x67   :  { %1438 = vmatpush.bf16.msrb.mxu3 %v2257_v15  ;;  %1406 = vmatpush.bf16.msrb.mxu2 %v2653_v19  ;;  %v2978_v40 = vld [vmem:[%s4561_s1 + $0x2b4] sm:$0xf0]  ;;  %v2480_v41 = vld [vmem:[%s4561_s1 + $0x3a8] sm:$0xf]  ;;  %v2225_v43 = vor.u32 %v2946_v33, %v2224_v32 }
  0x68   :  { %v3010_v42 = vld [vmem:[%s4561_s1 + $0x3b4] sm:$0xf0]  ;;  %v2080_v44 = vld [vmem:[%s4561_s1 + $0x88] sm:$0xf]  ;;  %v2353_v49 = vor.u32 %v2978_v40, %v2352_v37 }
  0x69   :  { %1451 = vmatpush.bf16.msra.mxu0 %v2385_v22  ;;  %1426 = vmatpush.bf16.msrb.mxu1 %v2113_v25  ;;  %v2910_v45 = vld [vmem:[%s4561_s1 + $0x94] sm:$0xf0]  ;;  %v2208_v46 = vld [vmem:[%s4561_s1 + $0x188] sm:$0xf]  ;;  %v2481_v50 = vor.u32 %v3010_v42, %v2480_v41 }
  0x6a   :  { %1407 = vmatmul.bf16.vlgmr.msrb.gmra.mxu2 %v3651_v39  ;;  %v2942_v47 = vld [vmem:[%s4561_s1 + $0x194] sm:$0xf0]  ;;  %v2336_v51 = vld [vmem:[%s4561_s1 + $0x288] sm:$0xf]  ;;  %v2081_v52 = vor.u32 %v2910_v45, %v2080_v44 }
  0x6b   :  { %1464 = vmatpush.bf16.msra.mxu2 %v2513_v23  ;;  %1439 = vmatpush.bf16.msrb.mxu3 %v2241_v29  ;;  %v2974_v54 = vld [vmem:[%s4561_s1 + $0x294] sm:$0xf0]  ;;  %v2464_v55 = vld [vmem:[%s4561_s1 + $0x388] sm:$0xf]  ;;  %v2209_v58 = vor.u32 %v2942_v47, %v2208_v46 }
  0x6c   :  { %v3006_v56 = vld [vmem:[%s4561_s1 + $0x394] sm:$0xf0]  ;;  %v2064_v59 = vld [vmem:[%s4561_s1 + $0x68] sm:$0xf]  ;;  %v2337_v0 = vor.u32 %v2974_v54, %v2336_v51  ;;  %v2920_v51 = vld [vmem:[%s4561_s1 + $0xec] sm:$0xf] }
  0x6d   :  { %1452 = vmatpush.bf16.msra.mxu0 %v2369_v35  ;;  %1427 = vmatpush.bf16.msrb.mxu1 %v2097_v38  ;;  %v2906_v61 = vld [vmem:[%s4561_s1 + $0x74] sm:$0xf0]  ;;  %v2192_v62 = vld [vmem:[%s4561_s1 + $0x168] sm:$0xf]  ;;  %v2465_v1 = vor.u32 %v3006_v56, %v2464_v55  ;;  %v2130_v55 = vld [vmem:[%s4561_s1 + $0xf8] sm:$0xf0] }
  0x6e   :  { %v2938_v63 = vld [vmem:[%s4561_s1 + $0x174] sm:$0xf0]  ;;  %v2320_v2 = vld [vmem:[%s4561_s1 + $0x268] sm:$0xf]  ;;  %v2065_v3 = vor.u32 %v2906_v61, %v2064_v59 }
  0x6f   :  { %1465 = vmatpush.bf16.msra.mxu2 %v2497_v36  ;;  %1440 = vmatpush.bf16.msrb.mxu3 %v2225_v43  ;;  %v2970_v4 = vld [vmem:[%s4561_s1 + $0x274] sm:$0xf0]  ;;  %v2448_v5 = vld [vmem:[%s4561_s1 + $0x368] sm:$0xf]  ;;  %v2193_v7 = vor.u32 %v2938_v63, %v2192_v62 }
  0x70   :  { %v3002_v6 = vld [vmem:[%s4561_s1 + $0x374] sm:$0xf0]  ;;  %v2048_v8 = vld [vmem:[%s4561_s1 + $0x48] sm:$0xf]  ;;  %v2321_v13 = vor.u32 %v2970_v4, %v2320_v2 }
  0x71   :  { %1453 = vmatpush.bf16.msra.mxu0 %v2353_v49  ;;  %1428 = vmatpush.bf16.msrb.mxu1 %v2081_v52  ;;  %v2902_v10 = vld [vmem:[%s4561_s1 + $0x54] sm:$0xf0]  ;;  %v2176_v11 = vld [vmem:[%s4561_s1 + $0x148] sm:$0xf]  ;;  %v2449_v14 = vor.u32 %v3002_v6, %v2448_v5  ;;  %v2952_v5 = vld [vmem:[%s4561_s1 + $0x1ec] sm:$0xf] }
  0x72   :  { %v2934_v12 = vld [vmem:[%s4561_s1 + $0x154] sm:$0xf0]  ;;  %v2304_v15 = vld [vmem:[%s4561_s1 + $0x248] sm:$0xf]  ;;  %v2049_v16 = vor.u32 %v2902_v10, %v2048_v8  ;;  %v2258_v6 = vld [vmem:[%s4561_s1 + $0x1f8] sm:$0xf0] }
  0x73   :  { %1466 = vmatpush.bf16.msra.mxu2 %v2481_v50  ;;  %1441 = vmatpush.bf16.msrb.mxu3 %v2209_v58  ;;  %v2966_v17 = vld [vmem:[%s4561_s1 + $0x254] sm:$0xf0]  ;;  %v2432_v18 = vld [vmem:[%s4561_s1 + $0x348] sm:$0xf]  ;;  %v2177_v20 = vor.u32 %v2934_v12, %v2176_v11  ;;  %v2916_v8 = vld [vmem:[%s4561_s1 + $0xcc] sm:$0xf] }
  0x74   :  { %v2998_v19 = vld [vmem:[%s4561_s1 + $0x354] sm:$0xf0]  ;;  %v2032_v21 = vld [vmem:[%s4561_s1 + $0x28] sm:$0xf]  ;;  %2791 = vmatmul.msk.bf16.vlgmr.msrb.gmra.mxu0 %vm1239_vm0, %v3552_v48  ;;  %v2305_v25 = vor.u32 %v2966_v17, %v2304_v15  ;;  %v2114_v10 = vld [vmem:[%s4561_s1 + $0xd8] sm:$0xf0] }
  0x75   :  { %1454 = vmatpush.bf16.msra.mxu0 %v2337_v0  ;;  %1429 = vmatpush.bf16.msrb.mxu1 %v2065_v3  ;;  %v2898_v22 = vld [vmem:[%s4561_s1 + $0x34] sm:$0xf0]  ;;  %v2160_v23 = vld [vmem:[%s4561_s1 + $0x128] sm:$0xf]  ;;  %v2433_v26 = vor.u32 %v2998_v19, %v2432_v18  ;;  %v2133_v3 = vor.u32 %v2920_v51, %v2130_v55  ;;  %v2117_v17 = vor.u32 %v2916_v8, %v2114_v10  ;;  %v2948_v18 = vld [vmem:[%s4561_s1 + $0x1cc] sm:$0xf] }
  0x76   :  { %v2930_v24 = vld [vmem:[%s4561_s1 + $0x134] sm:$0xf0]  ;;  %v2288_v27 = vld [vmem:[%s4561_s1 + $0x228] sm:$0xf]  ;;  %v2033_v29 = vor.u32 %v2898_v22, %v2032_v21  ;;  %v2242_v19 = vld [vmem:[%s4561_s1 + $0x1d8] sm:$0xf0] }
  0x77   :  { %1467 = vmatpush.bf16.msra.mxu2 %v2465_v1  ;;  %1442 = vmatpush.bf16.msrb.mxu3 %v2193_v7  ;;  %v2962_v28 = vld [vmem:[%s4561_s1 + $0x234] sm:$0xf0]  ;;  %v2416_v30 = vld [vmem:[%s4561_s1 + $0x328] sm:$0xf]  ;;  %v2161_v33 = vor.u32 %v2930_v24, %v2160_v23  ;;  %v2912_v21 = vld [vmem:[%s4561_s1 + $0xac] sm:$0xf] }
  0x78   :  { %v2994_v31 = vld [vmem:[%s4561_s1 + $0x334] sm:$0xf0]  ;;  %v2016_v32 = vld [vmem:[%s4561_s1 + $0x8] sm:$0xf]  ;;  %v2289_v42 = vor.u32 %v2962_v28, %v2288_v27  ;;  %v2098_v22 = vld [vmem:[%s4561_s1 + $0xb8] sm:$0xf0] }
  0x79   :  { %1455 = vmatpush.bf16.msra.mxu0 %v2321_v13  ;;  %1430 = vmatpush.bf16.msrb.mxu1 %v2049_v16  ;;  %v2894_v35 = vld [vmem:[%s4561_s1 + $0x14] sm:$0xf0]  ;;  %v2144_v36 = vld [vmem:[%s4561_s1 + $0x108] sm:$0xf]  ;;  %v2417_v43 = vor.u32 %v2994_v31, %v2416_v30  ;;  %v2944_v30 = vld [vmem:[%s4561_s1 + $0x1ac] sm:$0xf] }
  0x7a   :  { %v2926_v37 = vld [vmem:[%s4561_s1 + $0x114] sm:$0xf0]  ;;  %v2640_v38 = vld [vmem:[%s4561_s1 + $0x4e8] sm:$0xf]  ;;  %v2017_v47 = vor.u32 %v2894_v35, %v2016_v32  ;;  %v2226_v31 = vld [vmem:[%s4561_s1 + $0x1b8] sm:$0xf0] }
  0x7b   :  { %1468 = vmatpush.bf16.msra.mxu2 %v2449_v14  ;;  %1443 = vmatpush.bf16.msrb.mxu3 %v2177_v20  ;;  %v3050_v40 = vld [vmem:[%s4561_s1 + $0x4f4] sm:$0xf0]  ;;  %v2768_v41 = vld [vmem:[%s4561_s1 + $0x5e8] sm:$0xf]  ;;  %v2145_v52 = vor.u32 %v2926_v37, %v2144_v36  ;;  %v2261_v14 = vor.u32 %v2952_v5, %v2258_v6  ;;  %v2082_v35 = vld [vmem:[%s4561_s1 + $0x98] sm:$0xf0] }
  0x7c   :  { %v3082_v44 = vld [vmem:[%s4561_s1 + $0x5f4] sm:$0xf0]  ;;  %v2272_v45 = vld [vmem:[%s4561_s1 + $0x208] sm:$0xf]  ;;  %v2641_v54 = vor.u32 %v3050_v40, %v2640_v38  ;;  %v2229_v40 = vor.u32 %v2944_v30, %v2226_v31  ;;  %v2932_v8 = vld [vmem:[%s4561_s1 + $0x14c] sm:$0xf] }
  0x7d   :  { %1456 = vmatpush.bf16.msra.mxu0 %v2305_v25  ;;  %v2958_v46 = vld [vmem:[%s4561_s1 + $0x214] sm:$0xf0]  ;;  %1431 = vmatpush.bf16.msrb.mxu1 %v2033_v29  ;;  %v2400_v49 = vld [vmem:[%s4561_s1 + $0x308] sm:$0xf]  ;;  %v2769_v59 = vor.u32 %v3082_v44, %v2768_v41  ;;  %v2101_v29 = vor.u32 %v2912_v21, %v2098_v22  ;;  %v2940_v44 = vld [vmem:[%s4561_s1 + $0x18c] sm:$0xf] }
  0x7e   :  { %v2990_v50 = vld [vmem:[%s4561_s1 + $0x314] sm:$0xf0]  ;;  %v2784_v56 = vld [vmem:[%s4561_s1 + $0x608] sm:$0xf]  ;;  %v2273_v63 = vor.u32 %v2958_v46, %v2272_v45  ;;  %v2210_v45 = vld [vmem:[%s4561_s1 + $0x198] sm:$0xf0] }
  0x7f   :  { %1469 = vmatpush.bf16.msra.mxu2 %v2433_v26  ;;  %1444 = vmatpush.bf16.msrb.mxu3 %v2161_v33  ;;  %v3086_v58 = vld [vmem:[%s4561_s1 + $0x614] sm:$0xf0]  ;;  %v2624_v61 = vld [vmem:[%s4561_s1 + $0x4c8] sm:$0xf]  ;;  %v2401_v0 = vor.u32 %v2990_v50, %v2400_v49  ;;  %v2245_v26 = vor.u32 %v2948_v18, %v2242_v19  ;;  %v2908_v33 = vld [vmem:[%s4561_s1 + $0x8c] sm:$0xf] }
  0x80   :  { %v3046_v62 = vld [vmem:[%s4561_s1 + $0x4d4] sm:$0xf0]  ;;  %v2752_v1 = vld [vmem:[%s4561_s1 + $0x5c8] sm:$0xf]  ;;  %v2785_v4 = vor.u32 %v3086_v58, %v2784_v56  ;;  %v2066_v49 = vld [vmem:[%s4561_s1 + $0x78] sm:$0xf0] }
  0x81   :  { %1457 = vmatpush.bf16.msra.mxu0 %v2289_v42  ;;  %v3078_v2 = vld [vmem:[%s4561_s1 + $0x5d4] sm:$0xf0]  ;;  %1432 = vmatpush.bf16.msrb.mxu1 %v2017_v47  ;;  %v2625_v7 = vor.u32 %v3046_v62, %v2624_v61  ;;  %v2608_v12 = vld [vmem:[%s4561_s1 + $0x4a8] sm:$0xf]  ;;  %v2904_v47 = vld [vmem:[%s4561_s1 + $0x6c] sm:$0xf] }
  0x82   :  { %v2753_v11 = vor.u32 %v3078_v2, %v2752_v1  ;;  %v3042_v13 = vld [vmem:[%s4561_s1 + $0x4b4] sm:$0xf0]  ;;  %v2736_v15 = vld [vmem:[%s4561_s1 + $0x5a8] sm:$0xf]  ;;  %v2069_v58 = vor.u32 %v2904_v47, %v2066_v49  ;;  %v2194_v61 = vld [vmem:[%s4561_s1 + $0x178] sm:$0xf0] }
  0x83   :  { %1470 = vmatpush.bf16.msra.mxu2 %v2417_v43  ;;  %1445 = vmatpush.bf16.msrb.mxu3 %v2145_v52  ;;  %v3074_v16 = vld [vmem:[%s4561_s1 + $0x5b4] sm:$0xf0]  ;;  %v2609_v20 = vor.u32 %v3042_v13, %v2608_v12  ;;  %v2592_v24 = vld [vmem:[%s4561_s1 + $0x488] sm:$0xf]  ;;  %v2085_v43 = vor.u32 %v2908_v33, %v2082_v35  ;;  %v2178_v10 = vld [vmem:[%s4561_s1 + $0x158] sm:$0xf0] }
  0x84   :  { %v2737_v23 = vor.u32 %v3074_v16, %v2736_v15  ;;  %v3038_v25 = vld [vmem:[%s4561_s1 + $0x494] sm:$0xf0]  ;;  %1433 = vmatmul.bf16.vlgmr.msrb.gmra.mxu1 %v3443_v57  ;;  %v2720_v27 = vld [vmem:[%s4561_s1 + $0x588] sm:$0xf]  ;;  %v2896_v12 = vld [vmem:[%s4561_s1 + $0x2c] sm:$0xf]  ;;  %v2181_v19 = vor.u32 %v2932_v8, %v2178_v10 }
  0x85   :  { %1477 = vmatpush.bf16.msra.mxu1 %v2641_v54  ;;  %1458 = vmatpush.bf16.msra.mxu0 %v2273_v63  ;;  %v3070_v28 = vld [vmem:[%s4561_s1 + $0x594] sm:$0xf0]  ;;  %v2593_v32 = vor.u32 %v3038_v25, %v2592_v24  ;;  %v2576_v37 = vld [vmem:[%s4561_s1 + $0x468] sm:$0xf]  ;;  %v2213_v54 = vor.u32 %v2940_v44, %v2210_v45  ;;  %v2900_v63 = vld [vmem:[%s4561_s1 + $0x4c] sm:$0xf] }
  0x86   :  { %1446 = vmatmul.bf16.vlgmr.msrb.gmra.mxu3 %v3473_v9  ;;  %v2721_v36 = vor.u32 %v3070_v28, %v2720_v27  ;;  %v3034_v38 = vld [vmem:[%s4561_s1 + $0x474] sm:$0xf0]  ;;  %v2704_v41 = vld [vmem:[%s4561_s1 + $0x568] sm:$0xf]  ;;  %v2034_v13 = vld [vmem:[%s4561_s1 + $0x38] sm:$0xf0] }
  0x87   :  { %1490 = vmatpush.bf16.msra.mxu3 %v2769_v59  ;;  %1471 = vmatpush.bf16.msra.mxu2 %v2401_v0  ;;  %v3066_v42 = vld [vmem:[%s4561_s1 + $0x574] sm:$0xf0]  ;;  %v2577_v46 = vor.u32 %v3034_v38, %v2576_v37  ;;  %v2560_v51 = vld [vmem:[%s4561_s1 + $0x448] sm:$0xf]  ;;  %v2936_v59 = vld [vmem:[%s4561_s1 + $0x16c] sm:$0xf] }
  0x88   :  { %1459 = vmatmul.bf16.vlgmr.msra.gmra.mxu0 %v3432_v53  ;;  %v2705_v50 = vor.u32 %v3066_v42, %v2704_v41  ;;  %v3030_v52 = vld [vmem:[%s4561_s1 + $0x454] sm:$0xf0]  ;;  %v2688_v55 = vld [vmem:[%s4561_s1 + $0x548] sm:$0xf]  ;;  %v2050_v0 = vld [vmem:[%s4561_s1 + $0x58] sm:$0xf0] }
  0x89   :  { %1510 = vmatpush.bf16.msrb.mxu0 %v2785_v4  ;;  %1478 = vmatpush.bf16.msra.mxu1 %v2625_v7  ;;  %v3062_v56 = vld [vmem:[%s4561_s1 + $0x554] sm:$0xf0]  ;;  %v2561_v62 = vor.u32 %v3030_v52, %v2560_v51  ;;  %v2544_v2 = vld [vmem:[%s4561_s1 + $0x428] sm:$0xf]  ;;  %v2197_v4 = vor.u32 %v2936_v59, %v2194_v61  ;;  %v2053_v7 = vor.u32 %v2900_v63, %v2050_v0  ;;  %v2386_v21 = vld [vmem:[%s4561_s1 + $0x2f8] sm:$0xf0] }
  0x8a   :  { %1472 = vmatmul.bf16.vlgmr.msra.gmra.mxu2 %v3445_v60  ;;  %v2689_v1 = vor.u32 %v3062_v56, %v2688_v55  ;;  %v2672_v5 = vld [vmem:[%s4561_s1 + $0x528] sm:$0xf]  ;;  %v3058_v6 = vld [vmem:[%s4561_s1 + $0x534] sm:$0xf0]  ;;  %v3016_v22 = vld [vmem:[%s4561_s1 + $0x3ec] sm:$0xf] }
  0x8b   :  { %1516 = vmatpush.bf16.msrb.mxu2 %v2133_v3  ;;  %1491 = vmatpush.bf16.msra.mxu3 %v2753_v11  ;;  %v3026_v3 = vld [vmem:[%s4561_s1 + $0x434] sm:$0xf0]  ;;  %v2673_v15 = vor.u32 %v3058_v6, %v2672_v5  ;;  %v2514_v24 = vld [vmem:[%s4561_s1 + $0x3f8] sm:$0xf0]  ;;  %v2928_v25 = vld [vmem:[%s4561_s1 + $0x12c] sm:$0xf] }
  0x8c   :  { %v2545_v11 = vor.u32 %v3026_v3, %v2544_v2  ;;  %v3022_v16 = vld [vmem:[%s4561_s1 + $0x414] sm:$0xf0]  ;;  %v2892_v28 = vld [vmem:[%s4561_s1 + $0xc] sm:$0xf]  ;;  %v2642_v33 = vld [vmem:[%s4561_s1 + $0x4f8] sm:$0xf0]  ;;  %v2517_v35 = vor.u32 %v3016_v22, %v2514_v24 }
  0x8d   :  { %1529 = vmatpush.bf16.msra.mxu0 %v2261_v14  ;;  %1479 = vmatpush.bf16.msra.mxu1 %v2609_v20  ;;  %v2528_v14 = vld [vmem:[%s4561_s1 + $0x408] sm:$0xf]  ;;  %v3054_v18 = vld [vmem:[%s4561_s1 + $0x514] sm:$0xf0]  ;;  %v2984_v20 = vld [vmem:[%s4561_s1 + $0x2ec] sm:$0xf] }
  0x8e   :  { %v2529_v27 = vor.u32 %v3022_v16, %v2528_v14  ;;  %v2389_v31 = vor.u32 %v2984_v20, %v2386_v21  ;;  %v2980_v37 = vld [vmem:[%s4561_s1 + $0x2cc] sm:$0xf]  ;;  %v2370_v38 = vld [vmem:[%s4561_s1 + $0x2d8] sm:$0xf0] }
  0x8f   :  { %1517 = vmatpush.bf16.msrb.mxu2 %v2117_v17  ;;  %1492 = vmatpush.bf16.msra.mxu3 %v2737_v23  ;;  %v2656_v17 = vld [vmem:[%s4561_s1 + $0x508] sm:$0xf]  ;;  %v2037_v23 = vor.u32 %v2896_v12, %v2034_v13  ;;  %v2498_v42 = vld [vmem:[%s4561_s1 + $0x3d8] sm:$0xf0]  ;;  %v2373_v49 = vor.u32 %v2980_v37, %v2370_v38  ;;  %v2976_v55 = vld [vmem:[%s4561_s1 + $0x2ac] sm:$0xf] }
  0x90   :  { %v2657_v30 = vor.u32 %v3054_v18, %v2656_v17  ;;  %v2146_v44 = vld [vmem:[%s4561_s1 + $0x118] sm:$0xf0]  ;;  %v3008_v59 = vld [vmem:[%s4561_s1 + $0x3ac] sm:$0xf] }
  0x91   :  { %1530 = vmatpush.bf16.msra.mxu0 %v2245_v26  ;;  %1480 = vmatpush.bf16.msra.mxu1 %v2593_v32  ;;  %v2162_v26 = vld [vmem:[%s4561_s1 + $0x138] sm:$0xf0]  ;;  %v3048_v32 = vld [vmem:[%s4561_s1 + $0x4ec] sm:$0xf] }
  0x92   :  { %v2645_v45 = vor.u32 %v3048_v32, %v2642_v33  ;;  %v2770_v47 = vld [vmem:[%s4561_s1 + $0x5f8] sm:$0xf0]  ;;  %v3076_v63 = vld [vmem:[%s4561_s1 + $0x5cc] sm:$0xf] }
  0x93   :  { %1518 = vmatpush.bf16.msrb.mxu2 %v2101_v29  ;;  %1493 = vmatpush.bf16.msra.mxu3 %v2721_v36  ;;  %v2018_v29 = vld [vmem:[%s4561_s1 + $0x18] sm:$0xf0]  ;;  %v2165_v36 = vor.u32 %v2928_v25, %v2162_v26  ;;  %v3040_v2 = vld [vmem:[%s4561_s1 + $0x4ac] sm:$0xf] }
  0x94   :  { %v2021_v41 = vor.u32 %v2892_v28, %v2018_v29  ;;  %v2626_v51 = vld [vmem:[%s4561_s1 + $0x4d8] sm:$0xf0]  ;;  %v2972_v5 = vld [vmem:[%s4561_s1 + $0x28c] sm:$0xf] }
  0x95   :  { %1531 = vmatpush.bf16.msra.mxu0 %v2229_v40  ;;  %1481 = vmatpush.bf16.msra.mxu1 %v2577_v46  ;;  %v3012_v40 = vld [vmem:[%s4561_s1 + $0x3cc] sm:$0xf]  ;;  %v2354_v56 = vld [vmem:[%s4561_s1 + $0x2b8] sm:$0xf0] }
  0x96   :  { %v3080_v46 = vld [vmem:[%s4561_s1 + $0x5ec] sm:$0xf]  ;;  %v2501_v52 = vor.u32 %v3012_v40, %v2498_v42  ;;  %v2482_v61 = vld [vmem:[%s4561_s1 + $0x3b8] sm:$0xf0] }
  0x97   :  { %1519 = vmatpush.bf16.msrb.mxu2 %v2085_v43  ;;  %1494 = vmatpush.bf16.msra.mxu3 %v2705_v50  ;;  %v2924_v43 = vld [vmem:[%s4561_s1 + $0x10c] sm:$0xf]  ;;  %v2754_v0 = vld [vmem:[%s4561_s1 + $0x5d8] sm:$0xf0] }
  0x98   :  { %2792 = vmatmul.msk.bf16.vlgmr.msrb.gmra.mxu0 %vm1239_vm0, %v3552_v48  ;;  %v3044_v50 = vld [vmem:[%s4561_s1 + $0x4cc] sm:$0xf]  ;;  %v2610_v3 = vld [vmem:[%s4561_s1 + $0x4b8] sm:$0xf0] }
  0x99   :  { %1532 = vmatpush.bf16.msra.mxu0 %v2213_v54  ;;  %1482 = vmatpush.bf16.msra.mxu1 %v2561_v62  ;;  %v2149_v54 = vor.u32 %v2924_v43, %v2146_v44  ;;  %v2629_v62 = vor.u32 %v3044_v50, %v2626_v51  ;;  %v2338_v6 = vld [vmem:[%s4561_s1 + $0x298] sm:$0xf0]  ;;  %v3004_v8 = vld [vmem:[%s4561_s1 + $0x38c] sm:$0xf]  ;;  %v4372_v44 = vld [vmem:[%s4562_s2] sm:$0xf] }
  0x9a   :  { %v2466_v10 = vld [vmem:[%s4561_s1 + $0x398] sm:$0xf0]  ;;  %v3072_v12 = vld [vmem:[%s4561_s1 + $0x5ac] sm:$0xf]  ;;  %v2341_v14 = vor.u32 %v2972_v5, %v2338_v6 }
  0x9b   :  { %1520 = vmatpush.bf16.msrb.mxu2 %v2069_v58  ;;  %1495 = vmatpush.bf16.msra.mxu3 %v2689_v1  ;;  %v2773_v58 = vor.u32 %v3080_v46, %v2770_v47  ;;  %v2357_v1 = vor.u32 %v2976_v55, %v2354_v56  ;;  %v2738_v13 = vld [vmem:[%s4561_s1 + $0x5b8] sm:$0xf0]  ;;  %v2469_v16 = vor.u32 %v3004_v8, %v2466_v10  ;;  %v2968_v17 = vld [vmem:[%s4561_s1 + $0x26c] sm:$0xf] }
  0x9c   :  { %v2322_v18 = vld [vmem:[%s4561_s1 + $0x278] sm:$0xf0]  ;;  %v3000_v20 = vld [vmem:[%s4561_s1 + $0x36c] sm:$0xf] }
  0x9d   :  { %1533 = vmatpush.bf16.msra.mxu0 %v2197_v4  ;;  %1483 = vmatpush.bf16.msra.mxu1 %v2545_v11  ;;  %v2485_v4 = vor.u32 %v3008_v59, %v2482_v61  ;;  %v2613_v11 = vor.u32 %v3040_v2, %v2610_v3  ;;  %v2722_v24 = vld [vmem:[%s4561_s1 + $0x598] sm:$0xf0]  ;;  %v2325_v25 = vor.u32 %v2968_v17, %v2322_v18  ;;  %v3032_v26 = vld [vmem:[%s4561_s1 + $0x46c] sm:$0xf]  ;;  %v227_v59 = vperm.slane %v4372_v44, 0 }
  0x9e   :  { %v2964_v29 = vld [vmem:[%s4561_s1 + $0x24c] sm:$0xf]  ;;  %v2706_v38 = vld [vmem:[%s4561_s1 + $0x578] sm:$0xf0] }
  0x9f   :  { %1521 = vmatpush.bf16.msrb.mxu2 %v2053_v7  ;;  %1496 = vmatpush.bf16.msra.mxu3 %v2673_v15  ;;  %v2757_v7 = vor.u32 %v3076_v63, %v2754_v0  ;;  %v3036_v15 = vld [vmem:[%s4561_s1 + $0x48c] sm:$0xf]  ;;  %v2562_v43 = vld [vmem:[%s4561_s1 + $0x458] sm:$0xf0] }
  0xa0   :  { %v2996_v33 = vld [vmem:[%s4561_s1 + $0x34c] sm:$0xf]  ;;  %v2546_v63 = vld [vmem:[%s4561_s1 + $0x438] sm:$0xf0] }
  0xa1   :  { %1534 = vmatpush.bf16.msra.mxu0 %v2181_v19  ;;  %1484 = vmatpush.bf16.msra.mxu1 %v2529_v27  ;;  %v2741_v19 = vor.u32 %v3072_v12, %v2738_v13  ;;  %v2578_v27 = vld [vmem:[%s4561_s1 + $0x478] sm:$0xf0]  ;;  %v3064_v37 = vld [vmem:[%s4561_s1 + $0x56c] sm:$0xf] }
  0xa2   :  { %v3028_v42 = vld [vmem:[%s4561_s1 + $0x44c] sm:$0xf]  ;;  %v2709_v50 = vor.u32 %v3064_v37, %v2706_v38  ;;  %v2274_v2 = vld [vmem:[%s4561_s1 + $0x218] sm:$0xf0]  ;;  %v3089_v38 = vld [vmem:[%s4564_s4 + $0x10] sm:$0xff] }
  0xa3   :  { %1522 = vmatpush.bf16.msrb.mxu2 %v2037_v23  ;;  %1497 = vmatpush.bf16.msra.mxu3 %v2657_v30  ;;  %v3068_v23 = vld [vmem:[%s4561_s1 + $0x58c] sm:$0xf]  ;;  %v2306_v30 = vld [vmem:[%s4561_s1 + $0x258] sm:$0xf0]  ;;  %v2565_v55 = vor.u32 %v3028_v42, %v2562_v43  ;;  %v3101_v43 = vld [vmem:[%s4564_s4 + $0x70] sm:$0xff] }
  0xa4   :  { %1485 = vmatmul.bf16.vlgmr.msra.gmra.mxu1 %v3640_v34  ;;  %v2960_v47 = vld [vmem:[%s4561_s1 + $0x22c] sm:$0xf]  ;;  %v2402_v5 = vld [vmem:[%s4561_s1 + $0x318] sm:$0xf0] }
  0xa5   :  { %1542 = vmatpush.bf16.msrb.mxu1 %v2389_v31  ;;  %1535 = vmatpush.bf16.msra.mxu0 %v2165_v36  ;;  %v4327_v21 = vpop.f32.mrf.mxu0  ;;  %v2725_v31 = vor.u32 %v3068_v23, %v2722_v24  ;;  %v4347_v32 = vpop.f32.mrf.mxu1  ;;  %v2581_v36 = vor.u32 %v3032_v26, %v2578_v27  ;;  %v2992_v51 = vld [vmem:[%s4561_s1 + $0x32c] sm:$0xf]  ;;  %v2674_v12 = vld [vmem:[%s4561_s1 + $0x538] sm:$0xf0]  ;;  %v3093_v26 = vld [vmem:[%s4564_s4 + $0x30] sm:$0xff] }
  0xa6   :  { %1498 = vmatmul.bf16.vlgmr.msra.gmra.mxu3 %v3651_v39  ;;  %v3060_v56 = vld [vmem:[%s4561_s1 + $0x54c] sm:$0xf]  ;;  %v2658_v24 = vld [vmem:[%s4561_s1 + $0x518] sm:$0xf0] }
  0xa7   :  { %1555 = vmatpush.bf16.msrb.mxu3 %v2517_v35  ;;  %1523 = vmatpush.bf16.msrb.mxu2 %v2021_v41  ;;  %v2434_v35 = vld [vmem:[%s4561_s1 + $0x358] sm:$0xf0]  ;;  %v2309_v41 = vor.u32 %v2964_v29, %v2306_v30  ;;  %v2988_v3 = vld [vmem:[%s4561_s1 + $0x30c] sm:$0xf] }
  0xa8   :  { %v4361_v40 = vpop.f32.mrf.mxu2  ;;  %v3084_v6 = vld [vmem:[%s4561_s1 + $0x60c] sm:$0xf] }
  0xa9   :  { %1543 = vmatpush.bf16.msrb.mxu1 %v2373_v49  ;;  %1536 = vmatpush.bf16.msra.mxu0 %v2149_v54  ;;  %v4374_v46 = vpop.f32.mrf.mxu3  ;;  %v2290_v49 = vld [vmem:[%s4561_s1 + $0x238] sm:$0xf0]  ;;  %v3052_v23 = vld [vmem:[%s4561_s1 + $0x50c] sm:$0xf] }
  0xaa   :  { %1524 = vmatmul.bf16.vlgmr.msrb.gmra.mxu2 %v3443_v57  ;;  %v2594_v57 = vld [vmem:[%s4561_s1 + $0x498] sm:$0xf0]  ;;  %v2293_v61 = vor.u32 %v2960_v47, %v2290_v49  ;;  %v3092_v29 = vld [vmem:[%s4564_s4 + $0x28] sm:$0xff] }
  0xab   :  { %1568 = vmatpush.bf16.msra.mxu2 %v2645_v45  ;;  %1556 = vmatpush.bf16.msrb.mxu3 %v2501_v52  ;;  %v2597_v22 = vor.u32 %v3036_v15, %v2594_v57  ;;  %v2437_v45 = vor.u32 %v2996_v33, %v2434_v35  ;;  %v2418_v52 = vld [vmem:[%s4561_s1 + $0x338] sm:$0xf0]  ;;  %v3020_v15 = vld [vmem:[%s4561_s1 + $0x40c] sm:$0xf] }
  0xac   :  { %1537 = vmatmul.bf16.vlgmr.msra.gmra.mxu0 %v3473_v9  ;;  %v2450_v9 = vld [vmem:[%s4561_s1 + $0x378] sm:$0xf0]  ;;  %v2421_v0 = vor.u32 %v2992_v51, %v2418_v52  ;;  %v3088_v49 = vld [vmem:[%s4564_s4 + $0x8] sm:$0xff] }
  0xad   :  { %1581 = vmatpush.bf16.msrb.mxu0 %v2773_v58  ;;  %1544 = vmatpush.bf16.msrb.mxu1 %v2357_v1  ;;  %v2453_v28 = vor.u32 %v3000_v20, %v2450_v9  ;;  %v1254_v54 = vpop.f32.mrf.mxu0  ;;  %v2690_v58 = vld [vmem:[%s4561_s1 + $0x558] sm:$0xf0]  ;;  %v2956_v1 = vld [vmem:[%s4561_s1 + $0x20c] sm:$0xf]  ;;  %v1267_v8 = vpop.f32.mrf.mxu1 }
  0xae   :  { %v2530_v57 = vld [vmem:[%s4561_s1 + $0x418] sm:$0xf0] }
  0xaf   :  { %1569 = vmatpush.bf16.msra.mxu2 %v2629_v62  ;;  %1557 = vmatpush.bf16.msrb.mxu3 %v2485_v4  ;;  %v3024_v62 = vld [vmem:[%s4561_s1 + $0x42c] sm:$0xf]  ;;  %v2693_v4 = vor.u32 %v3060_v56, %v2690_v58  ;;  %v3094_v9 = vld [vmem:[%s4564_s4 + $0x38] sm:$0xff] }
  0xb0   :  { %v2549_v10 = vor.u32 %v3024_v62, %v2546_v63  ;;  %v1280_v13 = vpop.f32.mrf.mxu2  ;;  %v3090_v35 = vld [vmem:[%s4564_s4 + $0x18] sm:$0xff]  ;;  %v3100_v62 = vld [vmem:[%s4564_s4 + $0x68] sm:$0xff] }
  0xb1   :  { %1582 = vmatpush.bf16.msrb.mxu0 %v2757_v7  ;;  %1545 = vmatpush.bf16.msrb.mxu1 %v2341_v14  ;;  %v2786_v7 = vld [vmem:[%s4561_s1 + $0x618] sm:$0xf0]  ;;  %v2277_v14 = vor.u32 %v2956_v1, %v2274_v2  ;;  %v1293_v18 = vpop.f32.mrf.mxu3 }
  0xb2   :  { %v2789_v17 = vor.u32 %v3084_v6, %v2786_v7  ;;  %v3099_v7 = vld [vmem:[%s4564_s4 + $0x60] sm:$0xff] }
  0xb3   :  { %1570 = vmatpush.bf16.msra.mxu2 %v2613_v11  ;;  %1558 = vmatpush.bf16.msrb.mxu3 %v2469_v16  ;;  %v3056_v11 = vld [vmem:[%s4561_s1 + $0x52c] sm:$0xf]  ;;  %v2405_v16 = vor.u32 %v2988_v3, %v2402_v5  ;;  %v228_v3 = vperm.slane %v4372_v44, 1 }
  0xb4   :  { %v2677_v20 = vor.u32 %v3056_v11, %v2674_v12 }
  0xb5   :  { %1583 = vmatpush.bf16.msrb.mxu0 %v2741_v19  ;;  %1546 = vmatpush.bf16.msrb.mxu1 %v2325_v25  ;;  %v1253_v19 = vadd.f32 %v4327_v21, %v227_v59  ;;  %v2661_v25 = vor.u32 %v3052_v23, %v2658_v24  ;;  %v3087_v59 = vld [vmem:[%s4564_s4] sm:$0xff] }
  0xb6   :  { %v3095_v23 = vld [vmem:[%s4564_s4 + $0x40] sm:$0xff] }
  0xb7   :  { %1571 = vmatpush.bf16.msra.mxu2 %v2597_v22  ;;  %1559 = vmatpush.bf16.msrb.mxu3 %v2453_v28  ;;  %v2533_v22 = vor.u32 %v3020_v15, %v2530_v57  ;;  %v1266_v21 = vadd.f32 %v4347_v32, %v1253_v19  ;;  %v3096_v19 = vld [vmem:[%s4564_s4 + $0x48] sm:$0xff] }
  0xb9   :  { %1584 = vmatpush.bf16.msrb.mxu0 %v2725_v31  ;;  %1547 = vmatpush.bf16.msrb.mxu1 %v2309_v41  ;;  %v1330_v27 = vpop.f32.mrf.mxu2  ;;  %v1279_v28 = vadd.f32 %v4361_v40, %v1266_v21 }
  0xbb   :  { %1572 = vmatpush.bf16.msra.mxu2 %v2581_v36  ;;  %1560 = vmatpush.bf16.msrb.mxu3 %v2437_v45 }
  0xbd   :  { %1585 = vmatpush.bf16.msrb.mxu0 %v2709_v50  ;;  %1548 = vmatpush.bf16.msrb.mxu1 %v2293_v61 }
  0xbf   :  { %1573 = vmatpush.bf16.msra.mxu2 %v2565_v55  ;;  %1561 = vmatpush.bf16.msrb.mxu3 %v2421_v0 }
  0xc1   :  { %1586 = vmatpush.bf16.msrb.mxu0 %v2693_v4  ;;  %1549 = vmatpush.bf16.msrb.mxu1 %v2277_v14  ;;  %v1304_v30 = vpop.f32.mrf.mxu0  ;;  %v1317_v32 = vpop.f32.mrf.mxu1  ;;  %v3098_v14 = vld [vmem:[%s4564_s4 + $0x58] sm:$0xff] }
  0xc2   :  { %v1332_v33 = vpop.f32.mrf.mxu2 }
  0xc3   :  { %1574 = vmatpush.bf16.msra.mxu2 %v2549_v10  ;;  %1562 = vmatpush.bf16.msrb.mxu3 %v2405_v16 }
  0xc4   :  { %1550 = vmatmul.bf16.vlgmr.msrb.gmra.mxu1 %v3432_v53  ;;  %v1292_v53 = vadd.f32 %v4374_v46, %v1279_v28  ;;  %v4474_v46 = vld [vmem:[%s4563_s3] sm:$0xff] }
  0xc5   :  { %1601 = vmatpush.bf16.msra.mxu1 %v2789_v17  ;;  %1587 = vmatpush.bf16.msrb.mxu0 %v2677_v20  ;;  %v1647_v47 = vperm.slane %v4474_v46, 1  ;;  %v1671_v50 = vperm.slane %v4474_v46, 2  ;;  %v1691_v52 = vperm.slane %v4474_v46, 3  ;;  %v3097_v17 = vld [vmem:[%s4564_s4 + $0x50] sm:$0xff]  ;;  %v1648_v33 = vperm.slane %v4474_v46, 5 }
  0xc6   :  { %1563 = vmatmul.bf16.vlgmr.msrb.gmra.mxu3 %v3445_v60  ;;  %v3091_v60 = vld [vmem:[%s4564_s4 + $0x20] sm:$0xff]  ;;  %v1305_v31 = vadd.f32 %v1304_v30, %v1292_v53 }
  0xc7   :  { %1923 = vmatpush.bf16.msra.mxu3 %v3094_v9  ;;  %1575 = vmatpush.bf16.msra.mxu2 %v2533_v22  ;;  %v1655_v58 = vperm.slane %v1647_v47, 1  ;;  %v1679_v0 = vperm.slane %v1671_v50, 2  ;;  %v1699_v6 = vperm.slane %v1691_v52, 3 }
  0xc9   :  { %1588 = vmatpush.bf16.msrb.mxu0 %v2661_v25  ;;  %v1306_v40 = vpop.f32.mrf.mxu0  ;;  %v1343_v41 = vpop.f32.mrf.mxu3 }
  0xca   :  { %1576 = vmatmul.bf16.vlgmr.msra.gmra.mxu2 %v3640_v34  ;;  %v1318_v34 = vadd.f32 %v1317_v32, %v1305_v31  ;;  %v1319_v42 = vpop.f32.mrf.mxu1  ;;  %v1344_v11 = vadd.f32 %v1343_v41, %v228_v3  ;;  %v1616_v32 = vperm.slane %v4474_v46, 4 }
  0xcb   :  { %1924 = vmatpush.bf16.msra.mxu3 %v3093_v26  ;;  %v1656_v42 = vperm.slane %v1648_v33, 1 }
  0xcc   :  { %1589 = vmatmul.bf16.vlgmr.msrb.gmra.mxu0 %v3651_v39  ;;  %v1331_v36 = vadd.f32 %v1330_v27, %v1318_v34  ;;  %v3102_v39 = vld [vmem:[%s4564_s4 + $0x78] sm:$0xff]  ;;  %v1624_v40 = vperm.slane %v1616_v32, 0 }
  0xcd   :  { %1936 = vmatpush.bf16.msrb.mxu1 %v3102_v39  ;;  %v1356_v45 = vpop.f32.mrf.mxu2  ;;  %v1692_v39 = vperm.slane %v4474_v46, 7 }
  0xce   :  { %v1631_v37 = vmul.f32 0.5, %v1331_v36  ;;  %v1609_v54 = vmax.f32 %v1331_v36, 0.0  ;;  %v1703_v12 = vmul.f32 %v1699_v6, %v1331_v36  ;;  %v1357_v57 = vadd.f32 %v1356_v45, %v1344_v11 }
  0xcf   :  { %1925 = vmatpush.bf16.msra.mxu3 %v3092_v29  ;;  %v1700_v50 = vperm.slane %v1692_v39, 3  ;;  %v229_v6 = vperm.slane %v4372_v44, 2  ;;  %v230_v39 = vperm.slane %v4372_v44, 3 }
  0xd0   :  { %3113 = vtanh.f32 %v1631_v37  ;;  %v3110_v37 = vld [vmem:[%s4564_s4 + $0xb8] sm:$0xff] }
  0xd1   :  { %3115 = vtanh.f32 %v1331_v36  ;;  %1937 = vmatpush.bf16.msrb.mxu1 %v3101_v43  ;;  %v1345_v61 = vpop.f32.mrf.mxu3  ;;  %1949 = vmatpush.bf16.msrb.mxu2 %v3110_v37 }
  0xd3   :  { %1926 = vmatpush.bf16.msra.mxu3 %v3091_v60 }
  0xd4   :  { %2793 = vmatmul.msk.bf16.vlgmr.msra.gmra.mxu1 %vm1239_vm0, %v3552_v48  ;;  %v1615_v48 = vperm.slane %v4474_v46, 0 }
  0xd5   :  { %v1358_v1 = vpop.f32.mrf.mxu2  ;;  %1938 = vmatpush.bf16.msrb.mxu1 %v3100_v62 }
  0xd6   :  { %v3114_v51 = vpop.eup %3113  ;;  %v1623_v55 = vperm.slane %v1615_v48, 0  ;;  %v3107_v1 = vld [vmem:[%s4564_s4 + $0xa0] sm:$0xff] }
  0xd7   :  { %1927 = vmatpush.bf16.msra.mxu3 %v3090_v35  ;;  %v1639_v56 = vadd.f32 1.0, %v3114_v51  ;;  %v3116_v2 = vpop.eup %3115  ;;  %v1672_v35 = vperm.slane %v4474_v46, 6  ;;  %v3109_v46 = vld [vmem:[%s4564_s4 + $0xb0] sm:$0xff] }
  0xd8   :  { %v1627_v4 = vmul.f32 %v1623_v55, %v1609_v54  ;;  %v1683_v10 = vmul.f32 %v3116_v2, %v1679_v0  ;;  %1950 = vmatpush.bf16.msrb.mxu2 %v3109_v46 }
  0xd9   :  { %v1643_v63 = vmul.f32 0.5, %v1639_v56  ;;  %1939 = vmatpush.bf16.msrb.mxu1 %v3099_v7  ;;  %v1680_v45 = vperm.slane %v1672_v35, 2 }
  0xdb   :  { %1928 = vmatpush.bf16.msra.mxu3 %v3089_v38  ;;  %v1659_v5 = vmul.f32 %v1655_v58, %v1643_v63 }
  0xdd   :  { %v1663_v8 = vadd.f32 %v1659_v5, %v1627_v4  ;;  %1940 = vmatpush.bf16.msrb.mxu1 %v3098_v14  ;;  %v3106_v4 = vld [vmem:[%s4564_s4 + $0x98] sm:$0xff] }
  0xdf   :  { %1929 = vmatpush.bf16.msra.mxu3 %v3088_v49  ;;  %v1687_v13 = vadd.f32 %v1683_v10, %v1663_v8  ;;  %v3105_v8 = vld [vmem:[%s4564_s4 + $0x90] sm:$0xff] }
  0xe1   :  { %v1707_v15 = vadd.f32 %v1703_v12, %v1687_v13  ;;  %v1369_v18 = vpop.f32.mrf.mxu0  ;;  %1941 = vmatpush.bf16.msrb.mxu1 %v3097_v17  ;;  %v1382_v9 = vpop.f32.mrf.mxu1  ;;  %v3104_v12 = vld [vmem:[%s4564_s4 + $0x88] sm:$0xff] }
  0xe2   :  { %v1370_v20 = vadd.f32 %v1369_v18, %v1357_v57 }
  0xe3   :  { %1930 = vmatpush.bf16.msra.mxu3 %v3087_v59  ;;  %v1711_v16 = vpack.c.bf16 %v1707_v15, %v1707_v15  ;;  %v3108_v59 = vld [vmem:[%s4564_s4 + $0xa8] sm:$0xff]  ;;  %v3103_v15 = vld [vmem:[%s4564_s4 + $0x80] sm:$0xff] }
  0xe4   :  { %v1383_v22 = vadd.f32 %v1382_v9, %v1370_v20  ;;  %1951 = vmatpush.bf16.msrb.mxu2 %v3108_v59 }
  0xe5   :  { %1942 = vmatpush.bf16.msrb.mxu1 %v3096_v19 }
  0xe6   :  { %1931 = vmatmul.bf16.vlgmr.msra.gmra.mxu3 %v1711_v16 }
  0xe8   :  { %1952 = vmatpush.bf16.msrb.mxu2 %v3107_v1 }
  0xe9   :  { %v1371_v24 = vpop.f32.mrf.mxu0  ;;  %v1395_v21 = vpop.f32.mrf.mxu3  ;;  %1943 = vmatpush.bf16.msrb.mxu1 %v3095_v23 }
  0xea   :  { %v1396_v25 = vadd.f32 %v1395_v21, %v1383_v22  ;;  %v1384_v27 = vpop.f32.mrf.mxu1 }
  0xeb   :  { %v4537_v27 = vld [vmem:[%s4563_s3 + $0x8] sm:$0xff] }
  0xec   :  { %1953 = vmatpush.bf16.msrb.mxu2 %v3106_v4 }
  0xed   :  { %v1408_v26 = vpop.f32.mrf.mxu2 }
  0xee   :  { %v1409_v28 = vadd.f32 %v1408_v26, %v1396_v25 }
  0xf0   :  { %1954 = vmatpush.bf16.msrb.mxu2 %v3105_v8 }
  0xf1   :  { %v1421_v29 = vpop.f32.mrf.mxu0  ;;  %v1397_v53 = vpop.f32.mrf.mxu3 }
  0xf2   :  { %v1422_v30 = vadd.f32 %v1421_v29, %v1409_v28  ;;  %v1617_v28 = vperm.slane %v4537_v27, 0  ;;  %v1649_v29 = vperm.slane %v4537_v27, 1 }
  0xf4   :  { %v1632_v31 = vmul.f32 0.5, %v1422_v30  ;;  %v1610_v38 = vmax.f32 %v1422_v30, 0.0  ;;  %v1704_v56 = vmul.f32 %v1700_v50, %v1422_v30  ;;  %1955 = vmatpush.bf16.msrb.mxu2 %v3104_v12  ;;  %v1625_v33 = vperm.slane %v1617_v28, 0 }
  0xf5   :  { %v1410_v60 = vpop.f32.mrf.mxu2  ;;  %v1657_v35 = vperm.slane %v1649_v29, 1 }
  0xf6   :  { %3117 = vtanh.f32 %v1632_v31  ;;  %v1628_v47 = vmul.f32 %v1624_v40, %v1610_v38  ;;  %v1693_v31 = vperm.slane %v4537_v27, 3 }
  0xf7   :  { %3119 = vtanh.f32 %v1422_v30  ;;  %v1673_v30 = vperm.slane %v4537_v27, 2 }
  0xf8   :  { %1956 = vmatpush.bf16.msrb.mxu2 %v3103_v15  ;;  %v1694_v15 = vperm.slane %v4537_v27, 7 }
  0xf9   :  { %v1423_v34 = vpop.f32.mrf.mxu0  ;;  %v1681_v37 = vperm.slane %v1673_v30, 2 }
  0xfc   :  { %v3118_v36 = vpop.eup %3117 }
  0xfd   :  { %v1640_v41 = vadd.f32 1.0, %v3118_v36  ;;  %v3120_v48 = vpop.eup %3119 }
  0xfe   :  { %v1684_v55 = vmul.f32 %v3120_v48, %v1680_v45 }
  0xff   :  { %v1644_v43 = vmul.f32 0.5, %v1640_v41 }
 0x101   :  { %v1660_v49 = vmul.f32 %v1656_v42, %v1644_v43  ;;  %v1434_v52 = vpop.f32.mrf.mxu1  ;;  %v1701_v42 = vperm.slane %v1693_v31, 3 }
 0x102   :  { %v1435_v11 = vadd.f32 %v1434_v52, %v229_v6  ;;  %v1763_v52 = vld [vmem:[%s4564_s4 + $0xc0] sm:$0xf] }
 0x103   :  { %v1664_v54 = vadd.f32 %v1660_v49, %v1628_v47 }
 0x105   :  { %v1460_v51 = vpop.f32.mrf.mxu0  ;;  %v1688_v58 = vadd.f32 %v1684_v55, %v1664_v54  ;;  %v1865_v54 = vunpack.c.l.b16 %v1763_v52 }
 0x107   :  { %v1708_v62 = vadd.f32 %v1704_v56, %v1688_v58  ;;  %v1890_v44 = vpack.c.b16 %v1865_v54, %v1865_v54 }
 0x109   :  { %v1447_v61 = vpop.f32.mrf.mxu3  ;;  %v1712_v0 = vpack.c.bf16 %v1708_v62, %v1708_v62  ;;  %v1436_v3 = vpop.f32.mrf.mxu1 }
 0x10a   :  { %v1448_v13 = vadd.f32 %v1447_v61, %v1435_v11  ;;  %v1921_v61 = vsel %vm1919_vm1, %v1890_v44, 0  ;;  %v1650_v11 = vperm.slane %v4537_v27, 5 }
 0x10b   :  { %1944 = vmatmul.bf16.vlgmr.msrb.gmra.mxu1 %v1712_v0  ;;  %1969 = vmatpush.bf16.msra.mxu0 %v1921_v61 }
 0x10c   :  { %v1461_v57 = vadd.f32 %v1460_v51, %v1448_v13  ;;  %v1674_v13 = vperm.slane %v4537_v27, 6 }
 0x10d   :  { %v1462_v63 = vpop.f32.mrf.mxu0  ;;  %v1473_v2 = vpop.f32.mrf.mxu2 }
 0x10e   :  { %v1474_v17 = vadd.f32 %v1473_v2, %v1461_v57 }
 0x111   :  { %v1449_v5 = vpop.f32.mrf.mxu3 }
 0x115   :  { %v1512_v7 = vpop.f32.mrf.mxu0  ;;  %v1475_v10 = vpop.f32.mrf.mxu2 }
 0x116   :  { %v1618_v10 = vperm.slane %v4537_v27, 4 }
 0x11d   :  { %v1514_v14 = vpop.f32.mrf.mxu0 }
 0x121   :  { %v1486_v16 = vpop.f32.mrf.mxu1 }
 0x122   :  { %v1487_v18 = vadd.f32 %v1486_v16, %v1474_v17  ;;  %v1626_v16 = vperm.slane %v1618_v10, 0 }
 0x129   :  { %v1538_v19 = vpop.f32.mrf.mxu0  ;;  %v1499_v20 = vpop.f32.mrf.mxu3 }
 0x12a   :  { %v1500_v9 = vadd.f32 %v1499_v20, %v1487_v18  ;;  %v1488_v22 = vpop.f32.mrf.mxu1  ;;  %v1658_v18 = vperm.slane %v1650_v11, 1  ;;  %v1682_v20 = vperm.slane %v1674_v13, 2 }
 0x12c   :  { %v1513_v23 = vadd.f32 %v1512_v7, %v1500_v9 }
 0x12d   :  { %v1525_v24 = vpop.f32.mrf.mxu2 }
 0x12e   :  { %v1633_v21 = vmul.f32 0.5, %v1513_v23  ;;  %v1611_v32 = vmax.f32 %v1513_v23, 0.0  ;;  %v1526_v43 = vadd.f32 %v1525_v24, %v230_v39  ;;  %v1705_v50 = vmul.f32 %v1701_v42, %v1513_v23 }
 0x12f   :  { %v1702_v24 = vperm.slane %v1694_v15, 3 }
 0x130   :  { %3121 = vtanh.f32 %v1633_v21  ;;  %v1629_v40 = vmul.f32 %v1625_v33, %v1611_v32  ;;  %v1539_v51 = vadd.f32 %v1538_v19, %v1526_v43 }
 0x131   :  { %v1540_v25 = vpop.f32.mrf.mxu0  ;;  %v1501_v26 = vpop.f32.mrf.mxu3  ;;  %3123 = vtanh.f32 %v1513_v23 }
 0x135   :  { %v1527_v53 = vpop.f32.mrf.mxu2 }
 0x136   :  { %v3122_v60 = vpop.eup %3121 }
 0x137   :  { %v1641_v34 = vadd.f32 1.0, %v3122_v60  ;;  %v3124_v38 = vpop.eup %3123  ;;  %v3112_v60 = vld [vmem:[%s4565_s5] ss:$0 sm:$0xff]  ;;  %s3159_s5 = smov [#allocation2]  }
 0x138   :  { %v1685_v48 = vmul.f32 %v3124_v38, %v1681_v37  ;;  %s1995_s23 = sshll.u32 %s3159_s5, 4  ;;  %s1996_s23 = int_to_ptr.vmem [resolvable:$true] %s1995_s23 }
 0x139   :  { %v1645_v36 = vmul.f32 0.5, %v1641_v34 }
 0x13b   :  { %v1661_v41 = vmul.f32 %v1657_v35, %v1645_v36 }
 0x13d   :  { %v1665_v45 = vadd.f32 %v1661_v41, %v1629_v40 }
 0x13f   :  { %v1689_v49 = vadd.f32 %v1685_v48, %v1665_v45 }
 0x141   :  { %v1551_v47 = vpop.f32.mrf.mxu1  ;;  %v1709_v46 = vadd.f32 %v1705_v50, %v1689_v49 }
 0x142   :  { %v1552_v56 = vadd.f32 %v1551_v47, %v1539_v51 }
 0x143   :  { %v1713_v55 = vpack.c.bf16 %v1709_v46, %v1709_v46 }
 0x145   :  { %1957 = vmatmul.bf16.vlgmr.msrb.gmra.mxu2 %v1713_v55 }
 0x149   :  { %v1590_v58 = vpop.f32.mrf.mxu0  ;;  %v1564_v59 = vpop.f32.mrf.mxu3 }
 0x14a   :  { %v1565_v62 = vadd.f32 %v1564_v59, %v1552_v56  ;;  %v1553_v63 = vpop.f32.mrf.mxu1 }
 0x14d   :  { %v1577_v0 = vpop.f32.mrf.mxu2 }
 0x14e   :  { %v1578_v1 = vadd.f32 %v1577_v0, %v1565_v62 }
 0x150   :  { %v1591_v4 = vadd.f32 %v1590_v58, %v1578_v1 }
 0x151   :  { %v1592_v2 = vpop.f32.mrf.mxu0  ;;  %v1566_v3 = vpop.f32.mrf.mxu3 }
 0x152   :  { %v1603_v5 = vpop.f32.mrf.mxu1 }
 0x153   :  { %v1604_v6 = vadd.f32 %v1603_v5, %v1591_v4 }
 0x155   :  { %v1579_v7 = vpop.f32.mrf.mxu2  ;;  %v1634_v8 = vmul.f32 0.5, %v1604_v6  ;;  %v1612_v57 = vmax.f32 %v1604_v6, 0.0  ;;  %v1706_v28 = vmul.f32 %v1702_v24, %v1604_v6 }
 0x157   :  { %3125 = vtanh.f32 %v1634_v8  ;;  %v1630_v22 = vmul.f32 %v1626_v16, %v1612_v57 }
 0x158   :  { %3127 = vtanh.f32 %v1604_v6 }
 0x15a   :  { %v1605_v12 = vpop.f32.mrf.mxu1 }
 0x15d   :  { %v3126_v14 = vpop.eup %3125 }
 0x15e   :  { %v1642_v17 = vadd.f32 1.0, %v3126_v14  ;;  %v3128_v9 = vpop.eup %3127 }
 0x15f   :  { %v1686_v25 = vmul.f32 %v3128_v9, %v1682_v20 }
 0x160   :  { %v1646_v19 = vmul.f32 0.5, %v1642_v17 }
 0x162   :  { %v1662_v23 = vmul.f32 %v1658_v18, %v1646_v19 }
 0x164   :  { %v1666_v21 = vadd.f32 %v1662_v23, %v1630_v22 }
 0x166   :  { %v1690_v26 = vadd.f32 %v1686_v25, %v1666_v21 }
 0x168   :  { %v1710_v29 = vadd.f32 %v1706_v28, %v1690_v26 }
 0x169   :  { %v1932_v30 = vpop.f32.mrf.mxu3 }
 0x16a   :  { %v1714_v53 = vpack.c.bf16 %v1710_v29, %v1710_v29  ;;  %v1933_v31 = vadd.f32 %v3112_v60, %v1932_v30 }
 0x16c   :  { %2890 = vmatmul.msk.bf16.vlgmr.msra.gmra.mxu0 %vm1915_vm2, %v1714_v53 }
 0x171   :  { %v1934_v27 = vpop.f32.mrf.mxu3 }
 0x188   :  { %v1945_v32 = vpop.f32.mrf.mxu1 }
 0x189   :  { %v1946_v33 = vadd.f32 %v1945_v32, %v1933_v31 }
 0x190   :  { %v1947_v34 = vpop.f32.mrf.mxu1 }
 0x1c8   :  { %v1958_v35 = vpop.f32.mrf.mxu2 }
 0x1c9   :  { %v1959_v39 = vadd.f32 %v1958_v35, %v1946_v33 }
 0x1d0   :  { %v1960_v36 = vpop.f32.mrf.mxu2 }
 0x1e9   :  { %v1971_v37 = vpop.f32.mrf.mxu0 }
 0x1ea   :  { %v1972_v38 = vadd.f32 %v1971_v37, %v1959_v39 }
 0x1ec   :  { %v1976_v40 = vsel %vm1975_vm3, %v1972_v38, -inf }
 0x1ed   :  { %1977 = vmax.xlane.f32.xlu0 %v1976_v40 }
 0x1f1   :  { %v1973_v41 = vpop.f32.mrf.mxu0 }
 0x260   :  { %v1978_v42 = vpop.xlane.xlu0 %1977 }
 0x261   :  { %v1979_v43 = vsub.f32 %v1972_v38, %v1978_v42 }
 0x263   :  { %v1980_v45 = vmul.f32 1.442695, %v1979_v43 }
 0x265   :  { %3129 = vpow2.f32 %v1980_v45 }
 0x26b   :  { %v3130_v48 = vpop.eup %3129 }
 0x26c   :  { %v1982_v47 = vsel %vm1975_vm3, %v3130_v48, 0.0 }
 0x26d   :  { %1983 = vadd.xlane.f32.xlu0 %v1982_v47 }
 0x2e0   :  { %v1984_v49 = vpop.xlane.xlu0 %1983 }
 0x2e1   :  { %3131 = vlog2.f32 %v1984_v49 }
 0x2e7   :  { %v3132_v50 = vpop.eup %3131 }
 0x2e8   :  { %v1986_v51 = vmul.f32 0.6931472, %v3132_v50 }
 0x2ea   :  { %v1987_v46 = vadd.f32 %v1986_v51, %v1978_v42 }
 0x2ec   :  { %v1988_v52 = vsub.f32 %v1972_v38, %v1987_v46 }
 0x2ee   :  { %1989 = vst.msk [vmem:[#allocation2] sm:$0xff] %vm1975_vm3, %v1988_v52 }
 0x2ef   :  { %2000 = dma.vmem_to_hbm [thread:$0]  %s1996_s23, 128, %s1998_s26, [#allocation3]  }
 0x2f0   :  { %3157 = dma.done.wait [#allocation3], 128  }
 0x2f1   :  { %3158 = vsyncadd [#allocation3], 4294967168 }
 0x2f2   :  { %2005 = vsyncpa [#allocation3], 1 }

</bundles_post_ra>
